<compile_context>
chip_gen: v6e
topology: v6e:2x2x1
jax: 0.10.0
libtpu: 0.0.40
codegen_flags: <defaults>
</compile_context>

<pallas_src>
import jax
import jax.numpy as jnp
from jax import lax
from jax.experimental import pallas as pl
from jax.experimental.pallas import tpu as pltpu

EPS = 1e-3  # BatchNorm2d eps=0.001


def dwconv_bn_kernel(x_ref, w_ref, gamma_ref, beta_ref, o_ref, xpad_ref):
    # x_ref:     (N, H, W, Cb)        unpadded input channel-block
    # w_ref:     (9, Cb)              depthwise 3x3 taps, row index = dh*3+dw
    # gamma_ref: (1, Cb)              BN scale
    # beta_ref:  (1, Cb)              BN shift
    # o_ref:     (N, H, W, Cb)        output channel-block
    # xpad_ref:  (N, H+2, W+2, Cb)    VMEM scratch, halo-padded input
    N, H, W, Cb = o_ref.shape

    # Build the zero-padded input tile in VMEM.  The scratch persists across grid
    # steps, so it is fully re-initialized every step (halo zeros + interior copy).
    xpad_ref[...] = jnp.zeros_like(xpad_ref)
    xpad_ref[:, pl.ds(1, H), pl.ds(1, W), :] = x_ref[...]

    # --- depthwise 3x3 conv: 9 shifted multiply-accumulates on the VPU ---
    w = w_ref[...]  # (9, Cb), loaded once
    acc = xpad_ref[:, pl.ds(0, H), pl.ds(0, W), :] * w[0, :]
    for k in range(1, 9):
        dh, dw = divmod(k, 3)
        acc = acc + xpad_ref[:, pl.ds(dh, H), pl.ds(dw, W), :] * w[k, :]

    # --- BatchNorm2d (training-mode batch stats), single-pass per channel ---
    inv_cnt = 1.0 / float(N * H * W)
    s1 = jnp.sum(acc, axis=(0, 1, 2), keepdims=True)        # (1,1,1,Cb)
    s2 = jnp.sum(acc * acc, axis=(0, 1, 2), keepdims=True)  # (1,1,1,Cb)
    mean = s1 * inv_cnt
    var = s2 * inv_cnt - mean * mean
    scale = lax.rsqrt(var + EPS) * gamma_ref[0, :]           # (1,1,1,Cb)
    shift = beta_ref[0, :] - mean * scale                    # (1,1,1,Cb)
    o_ref[...] = (acc * scale + shift).astype(o_ref.dtype)


def _choose_block_c(C):
    """Channel block: multiple of 128, at most 4 grid steps."""
    n128 = pl.cdiv(C, 128)
    n_blocks = min(n128, 4)
    return pl.cdiv(n128, n_blocks) * 128


def dwconv_bn_nhwc(x_nhwc, w9, gamma, beta, block_c=None):
    """Fused depthwise-conv + BN on NHWC activations (preferred entry point).

    x_nhwc: (N, H, W, C) f32, w9: (9, C) f32 (taps flattened dh*3+dw),
    gamma/beta: (C,) f32.  Returns (N, H, W, C) f32.
    """
    N, H, W, C = x_nhwc.shape
    if block_c is None:
        block_c = _choose_block_c(C)
    Cp = pl.cdiv(C, block_c) * block_c
    pad_c = Cp - C

    # Pad channels to a multiple of the block so every lane tile is full.
    # (Padded lanes produce harmless zeros; sliced off below.)
    if pad_c:
        x_nhwc = jnp.pad(x_nhwc, ((0, 0), (0, 0), (0, 0), (0, pad_c)))
        w9 = jnp.pad(w9, ((0, 0), (0, pad_c)))
        gamma = jnp.pad(gamma, ((0, pad_c),))
        beta = jnp.pad(beta, ((0, pad_c),))
    gamma2 = gamma.reshape(1, Cp)
    beta2 = beta.reshape(1, Cp)

    out = pl.pallas_call(
        dwconv_bn_kernel,
        out_shape=jax.ShapeDtypeStruct((N, H, W, Cp), jnp.float32),
        grid=(Cp // block_c,),
        in_specs=[
            pl.BlockSpec((N, H, W, block_c), lambda c: (0, 0, 0, c)),
            pl.BlockSpec((9, block_c), lambda c: (0, c)),
            pl.BlockSpec((1, block_c), lambda c: (0, c)),
            pl.BlockSpec((1, block_c), lambda c: (0, c)),
        ],
        out_specs=pl.BlockSpec((N, H, W, block_c), lambda c: (0, 0, 0, c)),
        scratch_shapes=[pltpu.VMEM((N, H + 2, W + 2, block_c), jnp.float32)],
        compiler_params=pltpu.CompilerParams(
            dimension_semantics=("parallel",)),
    )(x_nhwc, w9, gamma2, beta2)

    if pad_c:
        out = out[..., :C]
    return out


def dwconv_bn(x_nchw, w_dw, gamma, beta, block_c=None):
    """PyTorch-layout shim.  x_nchw: (N, C, H, W) f32, w_dw: (C, 1, 3, 3) f32,
    gamma/beta: (C,) f32.  Returns (N, C, H, W) f32.

    The NCHW<->NHWC transposes here are extra HBM round trips; keep activations
    NHWC across the surrounding graph and use dwconv_bn_nhwc() to avoid them.
    """
    N, C, H, W = x_nchw.shape
    x_nhwc = jnp.transpose(x_nchw, (0, 2, 3, 1))
    w9 = jnp.transpose(w_dw[:, 0, :, :], (1, 2, 0)).reshape(9, C)  # (3,3,C)->(9,C)
    out_nhwc = dwconv_bn_nhwc(x_nhwc, w9, gamma, beta, block_c=block_c)
    return jnp.transpose(out_nhwc, (0, 3, 1, 2))


def reference(x_nchw, w_dw, gamma, beta):
    """Pure-JAX reference: depthwise conv + training-mode BatchNorm."""
    N, C, H, W = x_nchw.shape
    x_nhwc = jnp.transpose(x_nchw, (0, 2, 3, 1))
    k_hwio = jnp.transpose(w_dw, (2, 3, 1, 0))  # (3,3,1,C)
    y = lax.conv_general_dilated(
        x_nhwc, k_hwio, window_strides=(1, 1), padding=((1, 1), (1, 1)),
        dimension_numbers=("NHWC", "HWIO", "NHWC"), feature_group_count=C)
    mean = jnp.mean(y, axis=(0, 1, 2), keepdims=True)
    var = jnp.mean((y - mean) ** 2, axis=(0, 1, 2), keepdims=True)
    out = (y - mean) * lax.rsqrt(var + EPS) * gamma + beta
    return jnp.transpose(out, (0, 3, 1, 2))


if __name__ == "__main__":
    # Small shapes consistent with the module (original: N=1, C=1344, 14x14).
    # C=320 exercises both the channel grid (3 blocks of 128) and the C-padding path.
    N, C, H, W = 1, 320, 14, 14

    key = jax.random.PRNGKey(0)
    kx, kw, kg, kb = jax.random.split(key, 4)
    x = jax.random.normal(kx, (N, C, H, W), dtype=jnp.float32)
    w_dw = 0.1 * jax.random.normal(kw, (C, 1, 3, 3), dtype=jnp.float32)
    gamma = 1.0 + 0.1 * jax.random.normal(kg, (C,), dtype=jnp.float32)
    beta = 0.1 * jax.random.normal(kb, (C,), dtype=jnp.float32)

    out = dwconv_bn(x, w_dw, gamma, beta)
    jax.block_until_ready(out)

    ref = reference(x, w_dw, gamma, beta)
    assert out.shape == (N, C, H, W)
    max_err = float(jnp.max(jnp.abs(out - ref)))
    assert jnp.allclose(out, ref, atol=1e-4, rtol=1e-4), max_err

    print("KERNEL_OK")
</pallas_src>

<mosaic_0001>
module attributes {stable_mosaic.version = 11 : i64} {
  func.func @dwconv_bn_kernel(%arg0: i32, %arg1: memref<1x14x14x128xf32, #tpu.memory_space<vmem>>, %arg2: memref<9x128xf32, #tpu.memory_space<vmem>>, %arg3: memref<1x128xf32, #tpu.memory_space<vmem>>, %arg4: memref<1x128xf32, #tpu.memory_space<vmem>>, %arg5: memref<1x14x14x128xf32, #tpu.memory_space<vmem>>, %arg6: memref<1x16x16x128xf32, #tpu.memory_space<vmem>>) attributes {dimension_semantics = [#tpu.dimension_semantics<parallel>], iteration_bounds = array<i64: 3>, scalar_prefetch = 0 : i64, scratch_operands = 1 : i64, tpu.core_type = #tpu.core_type<tc>, window_params = [{transform_indices = @transform_0, window_bounds = array<i64: 1, 14, 14, 128>}, {transform_indices = @transform_1, window_bounds = array<i64: 9, 128>}, {transform_indices = @transform_2, window_bounds = array<i64: 1, 128>}, {transform_indices = @transform_3, window_bounds = array<i64: 1, 128>}, {transform_indices = @transform_4, window_bounds = array<i64: 1, 14, 14, 128>}]} {
    %cst = arith.constant 0.000000e+00 : f32
    %0 = vector.broadcast %cst : f32 to vector<1x16x16x128xf32>
    %c0 = arith.constant 0 : index
    %c0_0 = arith.constant 0 : index
    %c0_1 = arith.constant 0 : index
    %c0_2 = arith.constant 0 : index
    %1 = vector.load %arg6[%c0, %c0_0, %c0_1, %c0_2] : memref<1x16x16x128xf32, #tpu.memory_space<vmem>>, vector<1x16x16x128xf32>
    tpu.vector_store %arg6[%c0, %c0_0, %c0_1, %c0_2], %0 {strides = array<i32>} : memref<1x16x16x128xf32, #tpu.memory_space<vmem>>, vector<1x16x16x128xf32>,
    %c0_3 = arith.constant 0 : index
    %c0_4 = arith.constant 0 : index
    %c0_5 = arith.constant 0 : index
    %c0_6 = arith.constant 0 : index
    %2 = vector.load %arg1[%c0_3, %c0_4, %c0_5, %c0_6] : memref<1x14x14x128xf32, #tpu.memory_space<vmem>>, vector<1x14x14x128xf32>
    %c0_7 = arith.constant 0 : index
    %c1 = arith.constant 1 : index
    %c1_8 = arith.constant 1 : index
    %c0_9 = arith.constant 0 : index
    %3 = vector.load %arg6[%c0_7, %c1, %c1_8, %c0_9] : memref<1x16x16x128xf32, #tpu.memory_space<vmem>>, vector<1x14x14x128xf32>
    tpu.vector_store %arg6[%c0_7, %c1, %c1_8, %c0_9], %2 {strides = array<i32>} : memref<1x16x16x128xf32, #tpu.memory_space<vmem>>, vector<1x14x14x128xf32>,
    %c0_10 = arith.constant 0 : index
    %c0_11 = arith.constant 0 : index
    %4 = vector.load %arg2[%c0_10, %c0_11] : memref<9x128xf32, #tpu.memory_space<vmem>>, vector<9x128xf32>
    %c0_12 = arith.constant 0 : index
    %c0_13 = arith.constant 0 : index
    %c0_14 = arith.constant 0 : index
    %c0_15 = arith.constant 0 : index
    %5 = vector.load %arg6[%c0_12, %c0_13, %c0_14, %c0_15] : memref<1x16x16x128xf32, #tpu.memory_space<vmem>>, vector<1x14x14x128xf32>
    %6 = vector.extract_strided_slice %4 {offsets = [0, 0], sizes = [1, 128], strides = [1, 1]} : vector<9x128xf32> to vector<1x128xf32>
    %7 = vector.shape_cast %6 : vector<1x128xf32> to vector<128xf32>
    %8 = vector.shape_cast %7 : vector<128xf32> to vector<1x1x1x128xf32>
    %9 = vector.broadcast %8 : vector<1x1x1x128xf32> to vector<1x14x14x128xf32>
    %10 = arith.mulf %5, %9 : vector<1x14x14x128xf32>
    %c0_16 = arith.constant 0 : index
    %c0_17 = arith.constant 0 : index
    %c1_18 = arith.constant 1 : index
    %c0_19 = arith.constant 0 : index
    %11 = vector.load %arg6[%c0_16, %c0_17, %c1_18, %c0_19] : memref<1x16x16x128xf32, #tpu.memory_space<vmem>>, vector<1x14x14x128xf32>
    %12 = vector.extract_strided_slice %4 {offsets = [1, 0], sizes = [1, 128], strides = [1, 1]} : vector<9x128xf32> to vector<1x128xf32>
    %13 = vector.shape_cast %12 : vector<1x128xf32> to vector<128xf32>
    %14 = vector.shape_cast %13 : vector<128xf32> to vector<1x1x1x128xf32>
    %15 = vector.broadcast %14 : vector<1x1x1x128xf32> to vector<1x14x14x128xf32>
    %16 = arith.mulf %11, %15 : vector<1x14x14x128xf32>
    %17 = arith.addf %10, %16 : vector<1x14x14x128xf32>
    %c0_20 = arith.constant 0 : index
    %c0_21 = arith.constant 0 : index
    %c2 = arith.constant 2 : index
    %c0_22 = arith.constant 0 : index
    %18 = vector.load %arg6[%c0_20, %c0_21, %c2, %c0_22] : memref<1x16x16x128xf32, #tpu.memory_space<vmem>>, vector<1x14x14x128xf32>
    %19 = vector.extract_strided_slice %4 {offsets = [2, 0], sizes = [1, 128], strides = [1, 1]} : vector<9x128xf32> to vector<1x128xf32>
    %20 = vector.shape_cast %19 : vector<1x128xf32> to vector<128xf32>
    %21 = vector.shape_cast %20 : vector<128xf32> to vector<1x1x1x128xf32>
    %22 = vector.broadcast %21 : vector<1x1x1x128xf32> to vector<1x14x14x128xf32>
    %23 = arith.mulf %18, %22 : vector<1x14x14x128xf32>
    %24 = arith.addf %17, %23 : vector<1x14x14x128xf32>
    %c0_23 = arith.constant 0 : index
    %c1_24 = arith.constant 1 : index
    %c0_25 = arith.constant 0 : index
    %c0_26 = arith.constant 0 : index
    %25 = vector.load %arg6[%c0_23, %c1_24, %c0_25, %c0_26] : memref<1x16x16x128xf32, #tpu.memory_space<vmem>>, vector<1x14x14x128xf32>
    %26 = vector.extract_strided_slice %4 {offsets = [3, 0], sizes = [1, 128], strides = [1, 1]} : vector<9x128xf32> to vector<1x128xf32>
    %27 = vector.shape_cast %26 : vector<1x128xf32> to vector<128xf32>
    %28 = vector.shape_cast %27 : vector<128xf32> to vector<1x1x1x128xf32>
    %29 = vector.broadcast %28 : vector<1x1x1x128xf32> to vector<1x14x14x128xf32>
    %30 = arith.mulf %25, %29 : vector<1x14x14x128xf32>
    %31 = arith.addf %24, %30 : vector<1x14x14x128xf32>
    %c0_27 = arith.constant 0 : index
    %c1_28 = arith.constant 1 : index
    %c1_29 = arith.constant 1 : index
    %c0_30 = arith.constant 0 : index
    %32 = vector.load %arg6[%c0_27, %c1_28, %c1_29, %c0_30] : memref<1x16x16x128xf32, #tpu.memory_space<vmem>>, vector<1x14x14x128xf32>
    %33 = vector.extract_strided_slice %4 {offsets = [4, 0], sizes = [1, 128], strides = [1, 1]} : vector<9x128xf32> to vector<1x128xf32>
    %34 = vector.shape_cast %33 : vector<1x128xf32> to vector<128xf32>
    %35 = vector.shape_cast %34 : vector<128xf32> to vector<1x1x1x128xf32>
    %36 = vector.broadcast %35 : vector<1x1x1x128xf32> to vector<1x14x14x128xf32>
    %37 = arith.mulf %32, %36 : vector<1x14x14x128xf32>
    %38 = arith.addf %31, %37 : vector<1x14x14x128xf32>
    %c0_31 = arith.constant 0 : index
    %c1_32 = arith.constant 1 : index
    %c2_33 = arith.constant 2 : index
    %c0_34 = arith.constant 0 : index
    %39 = vector.load %arg6[%c0_31, %c1_32, %c2_33, %c0_34] : memref<1x16x16x128xf32, #tpu.memory_space<vmem>>, vector<1x14x14x128xf32>
    %40 = vector.extract_strided_slice %4 {offsets = [5, 0], sizes = [1, 128], strides = [1, 1]} : vector<9x128xf32> to vector<1x128xf32>
    %41 = vector.shape_cast %40 : vector<1x128xf32> to vector<128xf32>
    %42 = vector.shape_cast %41 : vector<128xf32> to vector<1x1x1x128xf32>
    %43 = vector.broadcast %42 : vector<1x1x1x128xf32> to vector<1x14x14x128xf32>
    %44 = arith.mulf %39, %43 : vector<1x14x14x128xf32>
    %45 = arith.addf %38, %44 : vector<1x14x14x128xf32>
    %c0_35 = arith.constant 0 : index
    %c2_36 = arith.constant 2 : index
    %c0_37 = arith.constant 0 : index
    %c0_38 = arith.constant 0 : index
    %46 = vector.load %arg6[%c0_35, %c2_36, %c0_37, %c0_38] : memref<1x16x16x128xf32, #tpu.memory_space<vmem>>, vector<1x14x14x128xf32>
    %47 = vector.extract_strided_slice %4 {offsets = [6, 0], sizes = [1, 128], strides = [1, 1]} : vector<9x128xf32> to vector<1x128xf32>
    %48 = vector.shape_cast %47 : vector<1x128xf32> to vector<128xf32>
    %49 = vector.shape_cast %48 : vector<128xf32> to vector<1x1x1x128xf32>
    %50 = vector.broadcast %49 : vector<1x1x1x128xf32> to vector<1x14x14x128xf32>
    %51 = arith.mulf %46, %50 : vector<1x14x14x128xf32>
    %52 = arith.addf %45, %51 : vector<1x14x14x128xf32>
    %c0_39 = arith.constant 0 : index
    %c2_40 = arith.constant 2 : index
    %c1_41 = arith.constant 1 : index
    %c0_42 = arith.constant 0 : index
    %53 = vector.load %arg6[%c0_39, %c2_40, %c1_41, %c0_42] : memref<1x16x16x128xf32, #tpu.memory_space<vmem>>, vector<1x14x14x128xf32>
    %54 = vector.extract_strided_slice %4 {offsets = [7, 0], sizes = [1, 128], strides = [1, 1]} : vector<9x128xf32> to vector<1x128xf32>
    %55 = vector.shape_cast %54 : vector<1x128xf32> to vector<128xf32>
    %56 = vector.shape_cast %55 : vector<128xf32> to vector<1x1x1x128xf32>
    %57 = vector.broadcast %56 : vector<1x1x1x128xf32> to vector<1x14x14x128xf32>
    %58 = arith.mulf %53, %57 : vector<1x14x14x128xf32>
    %59 = arith.addf %52, %58 : vector<1x14x14x128xf32>
    %c0_43 = arith.constant 0 : index
    %c2_44 = arith.constant 2 : index
    %c2_45 = arith.constant 2 : index
    %c0_46 = arith.constant 0 : index
    %60 = vector.load %arg6[%c0_43, %c2_44, %c2_45, %c0_46] : memref<1x16x16x128xf32, #tpu.memory_space<vmem>>, vector<1x14x14x128xf32>
    %61 = vector.extract_strided_slice %4 {offsets = [8, 0], sizes = [1, 128], strides = [1, 1]} : vector<9x128xf32> to vector<1x128xf32>
    %62 = vector.shape_cast %61 : vector<1x128xf32> to vector<128xf32>
    %63 = vector.shape_cast %62 : vector<128xf32> to vector<1x1x1x128xf32>
    %64 = vector.broadcast %63 : vector<1x1x1x128xf32> to vector<1x14x14x128xf32>
    %65 = arith.mulf %60, %64 : vector<1x14x14x128xf32>
    %66 = arith.addf %59, %65 : vector<1x14x14x128xf32>
    %cst_47 = arith.constant dense<0.000000e+00> : vector<128xf32>
    %67 = vector.multi_reduction <add>, %66, %cst_47 [0, 1, 2] : vector<1x14x14x128xf32> to vector<128xf32>
    %68 = vector.shape_cast %67 : vector<128xf32> to vector<1x1x1x128xf32>
    %69 = arith.mulf %66, %66 : vector<1x14x14x128xf32>
    %cst_48 = arith.constant dense<0.000000e+00> : vector<128xf32>
    %70 = vector.multi_reduction <add>, %69, %cst_48 [0, 1, 2] : vector<1x14x14x128xf32> to vector<128xf32>
    %71 = vector.shape_cast %70 : vector<128xf32> to vector<1x1x1x128xf32>
    %cst_49 = arith.constant 0.00510204071 : f32
    %72 = vector.broadcast %cst_49 : f32 to vector<1x1x1x128xf32>
    %73 = arith.mulf %68, %72 : vector<1x1x1x128xf32>
    %cst_50 = arith.constant 0.00510204071 : f32
    %74 = vector.broadcast %cst_50 : f32 to vector<1x1x1x128xf32>
    %75 = arith.mulf %71, %74 : vector<1x1x1x128xf32>
    %76 = arith.mulf %73, %73 : vector<1x1x1x128xf32>
    %77 = arith.subf %75, %76 : vector<1x1x1x128xf32>
    %cst_51 = arith.constant 1.000000e-03 : f32
    %78 = vector.broadcast %cst_51 : f32 to vector<1x1x1x128xf32>
    %79 = arith.addf %77, %78 : vector<1x1x1x128xf32>
    %80 = math.rsqrt %79 : vector<1x1x1x128xf32>
    %c0_52 = arith.constant 0 : index
    %c0_53 = arith.constant 0 : index
    %81 = vector.load %arg3[%c0_52, %c0_53] : memref<1x128xf32, #tpu.memory_space<vmem>>, vector<1x128xf32>
    %82 = vector.shape_cast %81 : vector<1x128xf32> to vector<128xf32>
    %83 = vector.shape_cast %82 : vector<128xf32> to vector<1x1x1x128xf32>
    %84 = arith.mulf %80, %83 : vector<1x1x1x128xf32>
    %c0_54 = arith.constant 0 : index
    %c0_55 = arith.constant 0 : index
    %85 = vector.load %arg4[%c0_54, %c0_55] : memref<1x128xf32, #tpu.memory_space<vmem>>, vector<1x128xf32>
    %86 = vector.shape_cast %85 : vector<1x128xf32> to vector<128xf32>
    %87 = arith.mulf %73, %84 : vector<1x1x1x128xf32>
    %88 = vector.shape_cast %86 : vector<128xf32> to vector<1x1x1x128xf32>
    %89 = arith.subf %88, %87 : vector<1x1x1x128xf32>
    %90 = vector.broadcast %84 : vector<1x1x1x128xf32> to vector<1x14x14x128xf32>
    %91 = arith.mulf %66, %90 : vector<1x14x14x128xf32>
    %92 = vector.broadcast %89 : vector<1x1x1x128xf32> to vector<1x14x14x128xf32>
    %93 = arith.addf %91, %92 : vector<1x14x14x128xf32>
    %c0_56 = arith.constant 0 : index
    %c0_57 = arith.constant 0 : index
    %c0_58 = arith.constant 0 : index
    %c0_59 = arith.constant 0 : index
    %94 = vector.load %arg5[%c0_56, %c0_57, %c0_58, %c0_59] : memref<1x14x14x128xf32, #tpu.memory_space<vmem>>, vector<1x14x14x128xf32>
    tpu.vector_store %arg5[%c0_56, %c0_57, %c0_58, %c0_59], %93 {strides = array<i32>} : memref<1x14x14x128xf32, #tpu.memory_space<vmem>>, vector<1x14x14x128xf32>,
    return
  }
  func.func @transform_0(%arg0: i32) -> (i32, i32, i32, i32) {
    %c0_i32 = arith.constant 0 : i32
    %c0_i32_0 = arith.constant 0 : i32
    %c0_i32_1 = arith.constant 0 : i32
    %c0_i32_2 = arith.constant 0 : i32
    return %c0_i32, %c0_i32_0, %c0_i32_1, %arg0 : i32, i32, i32, i32
  }
  func.func @transform_1(%arg0: i32) -> (i32, i32) {
    %c0_i32 = arith.constant 0 : i32
    %c0_i32_0 = arith.constant 0 : i32
    return %c0_i32, %arg0 : i32, i32
  }
  func.func @transform_2(%arg0: i32) -> (i32, i32) {
    %c0_i32 = arith.constant 0 : i32
    %c0_i32_0 = arith.constant 0 : i32
    return %c0_i32, %arg0 : i32, i32
  }
  func.func @transform_3(%arg0: i32) -> (i32, i32) {
    %c0_i32 = arith.constant 0 : i32
    %c0_i32_0 = arith.constant 0 : i32
    return %c0_i32, %arg0 : i32, i32
  }
  func.func @transform_4(%arg0: i32) -> (i32, i32, i32, i32) {
    %c0_i32 = arith.constant 0 : i32
    %c0_i32_0 = arith.constant 0 : i32
    %c0_i32_1 = arith.constant 0 : i32
    %c0_i32_2 = arith.constant 0 : i32
    return %c0_i32, %c0_i32_0, %c0_i32_1, %arg0 : i32, i32, i32, i32
  }
}

</mosaic_0001>

<bundles_post_ra>
// kernel: tpu_custom_call.1
= control target key start
LH: loop header
LB: loop body
LE: loop exit
PB: predicated region body
PF: predicated region fallthrough
CT: control target
= control target key end

     0   :  { %s1842_s15 = smov 0   ;;  %s1844_s16 = smov 0   ;;  %s2862_s0 = inlined_call_operand.vmem [shape: f32[1,14,14,384], index: 0, kind: input, shape index: {}]   ;;  %s2863_s1 = inlined_call_operand.vmem [shape: f32[9,384], index: 1, kind: input, shape index: {}]   ;;  %s2864_s2 = inlined_call_operand.vmem [shape: f32[1,384], index: 2, kind: input, shape index: {}]   ;;  %s2865_s3 = inlined_call_operand.vmem [shape: f32[1,384], index: 3, kind: input, shape index: {}]   ;;  %s2866_s4 = inlined_call_operand.vmem [shape: f32[1,14,14,384], index: 4, kind: output, shape index: {}]  }
   0x1   :  { %s1846_s17 = smov 0  }
   0x2 LB: > { %s1858_s18 = sadd.s32 4294967295, %s1814_s17   ;;  %s1861_s19 = sadd.s32 1, %s1814_s17   ;;  %s1814_s17 = sphi %s1846_s17, %s2921_s17   ;;  %s1810_s16 = sphi %s1844_s16, %s2920_s16   ;;  %s1806_s15 = sphi %s1842_s15, %s2919_s15  }
   0x3   : > { %s18_s20 = ssub.s32 %s1814_s17, %s1861_s19  ;;  %s21_s21 = sadd.s32 1, %s1810_s16 }
   0x4   : > { %p19_p0 = scmp.eq.s32.totalorder %s18_s20, 0  ;;  %p28_p1 = scmp.ne.s32.totalorder %s1810_s16, %s1806_s15 }
   0x5   : > { %p29_p2 = scmp.eq.s32.totalorder %s1814_s17, 0  ;;  %p136_p3 = scmp.eq.s32.totalorder %s1858_s18, 2 }
   0x6   : > { %s1871_s22 = scalar_select %p19_p0, %s1810_s16, %s21_s21  }
   0x7   : > { %p1873_p4 = por %p29_p2, %p28_p1  ;;  %p1877_p5 = por %p136_p3, %p28_p1 }
   0x8   : > { %p1751_p6 = scmp.ge.s32.totalorder %s1814_s17, 3 }
   0xa   : > { %158 = sbr.rel (%p1751_p6) target bundleno = 39 (0x27), region = 16 }
   0xf   : > { %161 = sbr.rel (!%p1873_p4) target bundleno = 34 (0x22), region = 20  ;;  %s163_s25 = sand.u32 (%p1873_p4), 1, %s1810_s16  }
  0x10   : > { %s1752_s26 = sshll.u32 (%p1873_p4), %s1814_s17, 3  ;;  %s1761_s27 = smul.u32 (%p1873_p4), 224, %s163_s25 }
  0x11   : > { %s1889_s30 = scalar_lea.vmem (%p1873_p4), %s2862_s0, %s1752_s26 }
  0x12   : > { %v250_v0 = vld [vmem:[%s1889_s30] sm:$0xff] (%p1873_p4)  ;;  %v252_v1 = vld [vmem:[%s1889_s30 + $0x18] sm:$0xff] (%p1873_p4)  ;;  %v254_v2 = vld [vmem:[%s1889_s30 + $0x30] sm:$0xff] (%p1873_p4)  ;;  %s1897_s5 = scalar_lea.vmem (%p1873_p4), [#allocation3], %s1761_s27 }
  0x13   : > { %v256_v3 = vld [vmem:[%s1889_s30 + $0x48] sm:$0xff] (%p1873_p4)  ;;  %v258_v4 = vld [vmem:[%s1889_s30 + $0x60] sm:$0xff] (%p1873_p4)  ;;  %v260_v5 = vld [vmem:[%s1889_s30 + $0x78] sm:$0xff] (%p1873_p4)  ;;  %251 = vst [vmem:[%s1897_s5] sm:$0xff] (%p1873_p4), %v250_v0 }
  0x14   : > { %253 = vst [vmem:[%s1897_s5 + $0x8] sm:$0xff] %v252_v1  ;;  %255 = vst [vmem:[%s1897_s5 + $0x10] sm:$0xff] %v254_v2  ;;  %v262_v6 = vld [vmem:[%s1889_s30 + $0x90] sm:$0xff]  ;;  %v264_v7 = vld [vmem:[%s1889_s30 + $0xa8] sm:$0xff] }
  0x15   : > { %257 = vst [vmem:[%s1897_s5 + $0x18] sm:$0xff] %v256_v3  ;;  %259 = vst [vmem:[%s1897_s5 + $0x20] sm:$0xff] %v258_v4  ;;  %v266_v8 = vld [vmem:[%s1889_s30 + $0xc0] sm:$0xff]  ;;  %v268_v9 = vld [vmem:[%s1889_s30 + $0xd8] sm:$0xff] }
  0x16   : > { %261 = vst [vmem:[%s1897_s5 + $0x28] sm:$0xff] %v260_v5  ;;  %263 = vst [vmem:[%s1897_s5 + $0x30] sm:$0xff] %v262_v6  ;;  %v270_v10 = vld [vmem:[%s1889_s30 + $0xf0] sm:$0xff]  ;;  %v272_v11 = vld [vmem:[%s1889_s30 + $0x108] sm:$0xff] }
  0x17   : > { %265 = vst [vmem:[%s1897_s5 + $0x38] sm:$0xff] %v264_v7  ;;  %267 = vst [vmem:[%s1897_s5 + $0x40] sm:$0xff] %v266_v8  ;;  %v274_v12 = vld [vmem:[%s1889_s30 + $0x120] sm:$0xff]  ;;  %v276_v13 = vld [vmem:[%s1889_s30 + $0x138] sm:$0xff] }
  0x18   : > { %269 = vst [vmem:[%s1897_s5 + $0x48] sm:$0xff] %v268_v9  ;;  %271 = vst [vmem:[%s1897_s5 + $0x50] sm:$0xff] %v270_v10  ;;  %v278_v14 = vld [vmem:[%s1889_s30 + $0x150] sm:$0xff]  ;;  %v280_v15 = vld [vmem:[%s1889_s30 + $0x168] sm:$0xff] }
  0x19   : > { %273 = vst [vmem:[%s1897_s5 + $0x58] sm:$0xff] %v272_v11  ;;  %275 = vst [vmem:[%s1897_s5 + $0x60] sm:$0xff] %v274_v12  ;;  %v282_v16 = vld [vmem:[%s1889_s30 + $0x180] sm:$0xff]  ;;  %v284_v17 = vld [vmem:[%s1889_s30 + $0x198] sm:$0xff] }
  0x1a   : > { %277 = vst [vmem:[%s1897_s5 + $0x68] sm:$0xff] %v276_v13  ;;  %279 = vst [vmem:[%s1897_s5 + $0x70] sm:$0xff] %v278_v14  ;;  %v286_v18 = vld [vmem:[%s1889_s30 + $0x1b0] sm:$0xff]  ;;  %v288_v19 = vld [vmem:[%s1889_s30 + $0x1c8] sm:$0xff] }
  0x1b   : > { %281 = vst [vmem:[%s1897_s5 + $0x78] sm:$0xff] %v280_v15  ;;  %283 = vst [vmem:[%s1897_s5 + $0x80] sm:$0xff] %v282_v16  ;;  %v290_v20 = vld [vmem:[%s1889_s30 + $0x1e0] sm:$0xff]  ;;  %v292_v21 = vld [vmem:[%s1889_s30 + $0x1f8] sm:$0xff] }
  0x1c   : > { %285 = vst [vmem:[%s1897_s5 + $0x88] sm:$0xff] %v284_v17  ;;  %287 = vst [vmem:[%s1897_s5 + $0x90] sm:$0xff] %v286_v18  ;;  %v294_v22 = vld [vmem:[%s1889_s30 + $0x210] sm:$0xff]  ;;  %v296_v23 = vld [vmem:[%s1889_s30 + $0x228] sm:$0xff] }
  0x1d   : > { %289 = vst [vmem:[%s1897_s5 + $0x98] sm:$0xff] %v288_v19  ;;  %291 = vst [vmem:[%s1897_s5 + $0xa0] sm:$0xff] %v290_v20  ;;  %v298_v24 = vld [vmem:[%s1889_s30 + $0x240] sm:$0xff]  ;;  %v300_v25 = vld [vmem:[%s1889_s30 + $0x258] sm:$0xff] }
  0x1e   : > { %293 = vst [vmem:[%s1897_s5 + $0xa8] sm:$0xff] %v292_v21  ;;  %295 = vst [vmem:[%s1897_s5 + $0xb0] sm:$0xff] %v294_v22  ;;  %v302_v26 = vld [vmem:[%s1889_s30 + $0x270] sm:$0xff]  ;;  %v304_v27 = vld [vmem:[%s1889_s30 + $0x288] sm:$0xff] }
  0x1f   : > { %297 = vst [vmem:[%s1897_s5 + $0xb8] sm:$0xff] %v296_v23  ;;  %299 = vst [vmem:[%s1897_s5 + $0xc0] sm:$0xff] %v298_v24 }
  0x20   : > { %301 = vst [vmem:[%s1897_s5 + $0xc8] sm:$0xff] %v300_v25  ;;  %303 = vst [vmem:[%s1897_s5 + $0xd0] sm:$0xff] %v302_v26 }
  0x21   : > { %305 = vst [vmem:[%s1897_s5 + $0xd8] sm:$0xff] %v304_v27 }
  0x22 PF: > { %311 = sbr.rel (!%p1873_p4) target bundleno = 39 (0x27), region = 58  ;;  %s313_s6 = sand.u32 (%p1873_p4), 1, %s1810_s16  }
  0x23   : > { %s1754_s7 = sshll.u32 (%p1873_p4), %s1814_s17, 3  ;;  %s1753_s8 = sshll.u32 (%p1873_p4), %s313_s6, 4 }
  0x24   : > { %s317_s11 = scalar_lea.vmem (%p1873_p4), %s2863_s1, %s1754_s7  ;;  %s315_s12 = scalar_lea.vmem (%p1873_p4), [#allocation4], %s1753_s8 }
  0x25   : > { %v348_v28 = vld [vmem:[%s317_s11] sm:$0xff] (%p1873_p4)  ;;  %v350_v29 = vld [vmem:[%s317_s11 + $0x18] sm:$0xff] (%p1873_p4) }
  0x26   : > { %349 = vst [vmem:[%s315_s12] sm:$0xff] (%p1873_p4), %v348_v28  ;;  %351 = vst [vmem:[%s315_s12 + $0x8] sm:$0xff] (%p1873_p4), %v350_v29 }
  0x27 PF: > { %p1755_p7 = scmp.ge.s32.totalorder %s1814_s17, 1  ;;  %p368_p8 = scmp.lt.s32.totalorder %s1814_s17, 4 }
  0x29   : > { %p369_p9 = pnand %p1755_p7, %p368_p8 }
  0x2b   : > { %372 = sbr.rel (%p369_p9) target bundleno = 301 (0x12d), region = 104 }
  0x30   : > { %s375_s13 = sand.u32 1, %s1806_s15   ;;  %v541_v30 = vlaneseq  ;;  %v1816_v31 = vmov 0.0   ;;  %vm1278_vm0 = vcmask 1045504   ;;  %p416_p10 = scmp.lt.s32.totalorder %s1858_s18, 2 }
  0x31   : > { %422 = vst [vmem:[#allocation2] sm:$0xff] %v1816_v31  ;;  %423 = vst [vmem:[#allocation2 + $0x8] sm:$0xff] %v1816_v31  ;;  %s1756_s14 = sshll.u32 %s375_s13, 4  ;;  %s1963_s17 = smul.u32 224, %s375_s13 }
  0x32   : > { %424 = vst [vmem:[#allocation2 + $0x10] sm:$0xff] %v1816_v31  ;;  %425 = vst [vmem:[#allocation2 + $0x18] sm:$0xff] %v1816_v31  ;;  %v1965_v32 = vshrl.u32 %v541_v30, 7  ;;  %s1967_s20 = scalar_lea.vmem [#allocation4], %s1756_s14  ;;  %s1758_s5 = sshll.u32 (%p1877_p5), %s1858_s18, 3 }
  0x33   : > { %426 = vst [vmem:[#allocation2 + $0x20] sm:$0xff] %v1816_v31  ;;  %427 = vst [vmem:[#allocation2 + $0x28] sm:$0xff] %v1816_v31  ;;  %v1970_v33 = vld [vmem:[%s1967_s20] sm:$0xff]  ;;  %s1974_s21 = scalar_lea.vmem [#allocation3], %s1963_s17  ;;  %s2710_s30 = scalar_lea.vmem [#allocation5], %s1963_s17 }
  0x34   : > { %428 = vst [vmem:[#allocation2 + $0x30] sm:$0xff] %v1816_v31  ;;  %429 = vst [vmem:[#allocation2 + $0x38] sm:$0xff] %v1816_v31  ;;  %v603_v34 = vsub.s32 1, %v1965_v32  ;;  %v454_v35 = vld [vmem:[%s1974_s21] sm:$0xff]  ;;  %v455_v36 = vld [vmem:[%s1974_s21 + $0x8] sm:$0x3f]  ;;  %s2797_s8 = scalar_lea.vmem (%p1877_p5), %s2866_s4, %s1758_s5 }
  0x35   : > { %430 = vst [vmem:[#allocation2 + $0x40] sm:$0xff] %v1816_v31  ;;  %431 = vst [vmem:[#allocation2 + $0x48] sm:$0xff] %v1816_v31  ;;  %v456_v37 = vld [vmem:[%s1974_s21 + $0x10] sm:$0xff]  ;;  %v457_v38 = vld [vmem:[%s1974_s21 + $0x18] sm:$0x3f]  ;;  %v867_v40 = vsub.s32 4, %v1965_v32 }
  0x36   : > { %432 = vst [vmem:[#allocation2 + $0x50] sm:$0xff] %v1816_v31  ;;  %433 = vst [vmem:[#allocation2 + $0x58] sm:$0xff] %v1816_v31  ;;  %v458_v39 = vld [vmem:[%s1974_s21 + $0x20] sm:$0xff]  ;;  %v1983_v41 = vrot.slane %v1970_v33, %v603_v34  ;;  %v459_v42 = vld [vmem:[%s1974_s21 + $0x28] sm:$0x3f]  ;;  %v1995_v49 = vsub.s32 0, %v1965_v32 }
  0x37   : > { %434 = vst [vmem:[#allocation2 + $0x60] sm:$0xff] %v1816_v31  ;;  %435 = vst [vmem:[#allocation2 + $0x68] sm:$0xff] %v1816_v31  ;;  %v460_v43 = vld [vmem:[%s1974_s21 + $0x30] sm:$0xff]  ;;  %v461_v44 = vld [vmem:[%s1974_s21 + $0x38] sm:$0x3f]  ;;  %v1989_v45 = vrot.slane %v1970_v33, %v867_v40  ;;  %v691_v53 = vsub.s32 2, %v1965_v32 }
  0x38   : > { %436 = vst [vmem:[#allocation2 + $0x70] sm:$0xff] %v1816_v31  ;;  %437 = vst [vmem:[#allocation2 + $0x78] sm:$0xff] %v1816_v31  ;;  %v462_v46 = vld [vmem:[%s1974_s21 + $0x40] sm:$0xff]  ;;  %v463_v47 = vld [vmem:[%s1974_s21 + $0x48] sm:$0x3f]  ;;  %v1998_v50 = vmul.f32 %v1983_v41, %v454_v35  ;;  %v609_v51 = vmul.f32 %v1983_v41, %v456_v37  ;;  %v611_v52 = vmul.f32 %v1983_v41, %v458_v39  ;;  %v1132_v57 = vsub.s32 7, %v1965_v32 }
  0x39   : > { %438 = vst [vmem:[#allocation2 + $0x80] sm:$0xff] %v1816_v31  ;;  %439 = vst [vmem:[#allocation2 + $0x88] sm:$0xff] %v1816_v31  ;;  %v464_v48 = vld [vmem:[%s1974_s21 + $0x50] sm:$0xff]  ;;  %v2004_v54 = vmul.f32 %v1989_v45, %v458_v39  ;;  %v613_v55 = vmul.f32 %v1983_v41, %v460_v43  ;;  %v875_v56 = vmul.f32 %v1989_v45, %v460_v43  ;;  %v465_v58 = vld [vmem:[%s1974_s21 + $0x58] sm:$0x3f]  ;;  %v779_v6 = vsub.s32 3, %v1965_v32 }
  0x3a   : > { %440 = vst [vmem:[#allocation2 + $0x90] sm:$0xff] %v1816_v31  ;;  %441 = vst [vmem:[#allocation2 + $0x98] sm:$0xff] %v1816_v31  ;;  %v617_v59 = vmul.f32 %v1983_v41, %v464_v48  ;;  %v2012_v60 = vld [vmem:[%s1974_s21 + $0x60] sm:$0xff]  ;;  %v467_v61 = vld [vmem:[%s1974_s21 + $0x68] sm:$0x3f]  ;;  %v2020_v63 = vrot.slane %v1970_v33, %v1995_v49  ;;  %v2023_v0 = vmul.f32 %v1989_v45, %v464_v48  ;;  %v955_v24 = vsub.s32 5, %v1965_v32 }
  0x3b   : > { %442 = vst [vmem:[#allocation2 + $0xa0] sm:$0xff] %v1816_v31  ;;  %443 = vst [vmem:[#allocation2 + $0xa8] sm:$0xff] %v1816_v31  ;;  %v2016_v62 = vld [vmem:[%s1974_s21 + $0x70] sm:$0xff]  ;;  %v2028_v1 = vmul.f32 %v1983_v41, %v2012_v60  ;;  %v2032_v2 = vrot.slane %v1970_v33, %v691_v53  ;;  %v2040_v7 = vrot.slane %v1970_v33, %v1132_v57  ;;  %s417_s15 = scalar_select %p416_p10, %s1858_s18, 2 }
  0x3c   : > { %444 = vst [vmem:[#allocation2 + $0xb0] sm:$0xff] %v1816_v31  ;;  %445 = vst [vmem:[#allocation2 + $0xb8] sm:$0xff] %v1816_v31  ;;  %v2055_v15 = vrot.slane %v1970_v33, %v779_v6  ;;  %v615_v27 = vmul.f32 %v1983_v41, %v462_v46  ;;  %v471_v6 = vld [vmem:[%s1974_s21 + $0x88] sm:$0x3f] }
  0x3d   : > { %446 = vst [vmem:[#allocation2 + $0xc0] sm:$0xff] %v1816_v31  ;;  %447 = vst [vmem:[#allocation2 + $0xc8] sm:$0xff] %v1816_v31  ;;  %v2046_v11 = vmul.f32 %v2040_v7, %v464_v48  ;;  %s418_s26 = scalar_lea.vmem %s2864_s2, %s417_s15  ;;  %s421_s29 = scalar_lea.vmem %s2865_s3, %s417_s15 }
  0x3e   : > { %448 = vst [vmem:[#allocation2 + $0xd0] sm:$0xff] %v1816_v31  ;;  %449 = vst [vmem:[#allocation2 + $0xd8] sm:$0xff] %v1816_v31 }
  0x3f   : > { %450 = vst [vmem:[#allocation2 + $0xe0] sm:$0xff] %v1816_v31  ;;  %451 = vst [vmem:[#allocation2 + $0xe8] sm:$0xff] %v1816_v31 }
  0x40   : > { %452 = vst [vmem:[#allocation2 + $0xf0] sm:$0xff] %v1816_v31  ;;  %453 = vst [vmem:[#allocation2 + $0xf8] sm:$0xff] %v1816_v31 }
  0x41   : > { %483 = vst [vmem:[#allocation2 + $0x11] sm:$0xff] %v454_v35  ;;  %484 = vst [vmem:[#allocation2 + $0x19] sm:$0x3f] %v455_v36  ;;  %v877_v36 = vmul.f32 %v1989_v45, %v462_v46 }
  0x42   : > { %485 = vst [vmem:[#allocation2 + $0x21] sm:$0xff] %v456_v37  ;;  %486 = vst [vmem:[#allocation2 + $0x29] sm:$0x3f] %v457_v38  ;;  %v1044_v37 = vsub.s32 6, %v1965_v32  ;;  %v2078_v38 = vrot.slane %v1970_v33, %v955_v24  ;;  %v2123_v24 = vld [vmem:[%s1974_s21 + $0xd0] sm:$0xff] }
  0x43   : > { %487 = vst [vmem:[#allocation2 + $0x31] sm:$0xff] %v458_v39  ;;  %488 = vst [vmem:[#allocation2 + $0x39] sm:$0x3f] %v459_v42 }
  0x44   : > { %489 = vst [vmem:[#allocation2 + $0x41] sm:$0xff] %v460_v43  ;;  %490 = vst [vmem:[#allocation2 + $0x49] sm:$0x3f] %v461_v44 }
  0x45   : > { %2879 = vst [vmem:[#allocation6_spill] sm:$0xff] %v1995_v49  ;;  %491 = vst [vmem:[#allocation2 + $0x51] sm:$0xff] %v462_v46 }
  0x46   : > { %492 = vst [vmem:[#allocation2 + $0x59] sm:$0x3f] %v463_v47  ;;  %493 = vst [vmem:[#allocation2 + $0x61] sm:$0xff] %v464_v48  ;;  %v2083_v48 = vrot.slane %v1970_v33, %v1044_v37 }
  0x47   : > { %2880 = vst [vmem:[#allocation7_spill] sm:$0xff] %v2004_v54  ;;  %494 = vst [vmem:[#allocation2 + $0x69] sm:$0x3f] %v465_v58 }
  0x48   : > { %495 = vst [vmem:[#allocation2 + $0x71] sm:$0xff] %v2012_v60  ;;  %496 = vst [vmem:[#allocation2 + $0x79] sm:$0x3f] %v467_v61 }
  0x49   : > { %497 = vst [vmem:[#allocation2 + $0x81] sm:$0xff] %v2016_v62  ;;  %v2034_v3 = vld [vmem:[#allocation2 + $0x20] sm:$0xff]  ;;  %2881 = vst [vmem:[#allocation8_spill] sm:$0xff] %v2046_v11  ;;  %v752_v49 = vld [vmem:[#allocation2 + $0x28] sm:$0x3f] }
  0x4a   : > { %v549_v4 = vmul.f32 %v2020_v63, %v2034_v3  ;;  %v665_v5 = vld [vmem:[#allocation2 + $0x22] sm:$0xff]  ;;  %v2043_v10 = vld [vmem:[#allocation2 + $0x30] sm:$0xff]  ;;  %500 = vst [vmem:[#allocation2 + $0x99] sm:$0x3f] %v471_v6  ;;  %509 = vst [vmem:[#allocation2 + $0xe1] sm:$0xff] %v2123_v24 }
  0x4b   : > { %v697_v8 = vmul.f32 %v2032_v2, %v665_v5  ;;  %v551_v12 = vmul.f32 %v2020_v63, %v2043_v10  ;;  %v2050_v13 = vld [vmem:[#allocation2 + $0x32] sm:$0xff]  ;;  %v521_v17 = vld [vmem:[#allocation2 + $0x40] sm:$0xff]  ;;  %v932_v54 = vld [vmem:[#allocation2 + $0x4a] sm:$0x3f] }
  0x4c   : > { %v637_v9 = vadd.f32 %v609_v51, %v549_v4  ;;  %2882 = vst [vmem:[#allocation9_spill] sm:$0xff] %v2050_v13  ;;  %v699_v16 = vmul.f32 %v2032_v2, %v2050_v13  ;;  %v2059_v19 = vld [vmem:[#allocation2 + $0x42] sm:$0xff]  ;;  %v553_v20 = vmul.f32 %v2020_v63, %v521_v17  ;;  %v787_v21 = vmul.f32 %v2055_v15, %v521_v17  ;;  %v2063_v23 = vld [vmem:[#allocation2 + $0x50] sm:$0xff]  ;;  %v469_v4 = vld [vmem:[%s1974_s21 + $0x78] sm:$0x3f] }
  0x4d   : > { %v639_v18 = vadd.f32 %v611_v52, %v551_v12  ;;  %v701_v26 = vmul.f32 %v2032_v2, %v2059_v19  ;;  %v555_v30 = vmul.f32 %v2020_v63, %v2063_v23  ;;  %v671_v31 = vld [vmem:[#allocation2 + $0x52] sm:$0xff]  ;;  %v789_v35 = vmul.f32 %v2055_v15, %v2063_v23  ;;  %v525_v44 = vld [vmem:[#allocation2 + $0x60] sm:$0xff]  ;;  %498 = vst [vmem:[#allocation2 + $0x89] sm:$0x3f] %v469_v4 }
  0x4e   : > { %v2052_v14 = vadd.f32 %v697_v8, %v637_v9  ;;  %v641_v25 = vadd.f32 %v613_v55, %v553_v20  ;;  %v703_v42 = vmul.f32 %v2032_v2, %v671_v31  ;;  %v965_v43 = vmul.f32 %v2078_v38, %v671_v31  ;;  %v2085_v51 = vld [vmem:[#allocation2 + $0x62] sm:$0xff]  ;;  %v2101_v8 = vld [vmem:[%s1974_s21 + $0x90] sm:$0xff]  ;;  %v473_v9 = vld [vmem:[%s1974_s21 + $0x98] sm:$0x3f] }
  0x4f   : > { %v727_v22 = vadd.f32 %v699_v16, %v639_v18  ;;  %v643_v39 = vadd.f32 %v615_v27, %v555_v30  ;;  %v557_v52 = vmul.f32 %v2020_v63, %v525_v44  ;;  %v791_v53 = vmul.f32 %v2055_v15, %v525_v44  ;;  %v527_v57 = vld [vmem:[#allocation2 + $0x70] sm:$0xff]  ;;  %v2096_v5 = vld [vmem:[%s1974_s21 + $0x80] sm:$0xff]  ;;  %501 = vst [vmem:[#allocation2 + $0xa1] sm:$0xff] %v2101_v8  ;;  %v475_v18 = vld [vmem:[%s1974_s21 + $0xa8] sm:$0x3f] }
  0x50   : > { %v729_v29 = vadd.f32 %v701_v26, %v641_v25  ;;  %v1054_v55 = vmul.f32 %v2083_v48, %v525_v44  ;;  %499 = vst [vmem:[#allocation2 + $0x91] sm:$0xff] %v2096_v5  ;;  %v967_v17 = vmul.f32 %v2078_v38, %v2085_v51  ;;  %502 = vst [vmem:[#allocation2 + $0xa9] sm:$0x3f] %v473_v9  ;;  %v2114_v20 = vld [vmem:[%s1974_s21 + $0xb0] sm:$0xff]  ;;  %v481_v27 = vld [vmem:[%s1974_s21 + $0xd8] sm:$0x3f] }
  0x51   : > { %v815_v28 = vadd.f32 %v787_v21, %v727_v22  ;;  %v731_v46 = vadd.f32 %v703_v42, %v643_v39  ;;  %v645_v58 = vadd.f32 %v617_v59, %v557_v52  ;;  %v2105_v59 = vld [vmem:[%s1974_s21 + $0xa0] sm:$0xff]  ;;  %v477_v21 = vld [vmem:[%s1974_s21 + $0xb8] sm:$0x3f]  ;;  %504 = vst [vmem:[#allocation2 + $0xb9] sm:$0x3f] %v475_v18  ;;  %505 = vst [vmem:[#allocation2 + $0xc1] sm:$0xff] %v2114_v20 }
  0x52   : > { %v817_v40 = vadd.f32 %v789_v35, %v729_v29  ;;  %503 = vst [vmem:[#allocation2 + $0xb1] sm:$0xff] %v2105_v59  ;;  %506 = vst [vmem:[#allocation2 + $0xc9] sm:$0x3f] %v477_v21  ;;  %v2119_v22 = vld [vmem:[%s1974_s21 + $0xc0] sm:$0xff]  ;;  %v559_v26 = vmul.f32 %v2020_v63, %v527_v57  ;;  %v881_v29 = vmul.f32 %v1989_v45, %v2012_v60  ;;  %v675_v30 = vld [vmem:[#allocation2 + $0x72] sm:$0xff] }
  0x53   : > { %v2071_v34 = vadd.f32 %v875_v56, %v815_v28  ;;  %v705_v56 = vmul.f32 %v2032_v2, %v2085_v51  ;;  %v819_v33 = vadd.f32 %v791_v53, %v731_v46  ;;  %507 = vst [vmem:[#allocation2 + $0xd1] sm:$0xff] %v2119_v22  ;;  %v793_v28 = vmul.f32 %v2055_v15, %v527_v57  ;;  %v529_v44 = vld [vmem:[#allocation2 + $0x80] sm:$0xff] }
  0x54   : > { %v905_v47 = vadd.f32 %v877_v36, %v817_v40  ;;  %510 = vst [vmem:[#allocation2 + $0xe9] sm:$0x3f] %v481_v27  ;;  %v647_v31 = vadd.f32 %v2028_v1, %v559_v26  ;;  %v1056_v35 = vmul.f32 %v2083_v48, %v527_v57  ;;  %v1144_v36 = vmul.f32 %v2040_v7, %v2012_v60  ;;  %v677_v57 = vld [vmem:[#allocation2 + $0x82] sm:$0xff] }
  0x55   : > { %2883 = vst [vmem:[#allocation10_spill] sm:$0xff] %v2071_v34  ;;  %v907_v12 = vadd.f32 %v2023_v0, %v819_v33  ;;  %v733_v16 = vadd.f32 %v705_v56, %v645_v58  ;;  %v479_v0 = vld [vmem:[%s1974_s21 + $0xc8] sm:$0x3f]  ;;  %v707_v40 = vmul.f32 %v2032_v2, %v675_v30  ;;  %v561_v53 = vmul.f32 %v2020_v63, %v529_v44 }
  0x56   : > { %v993_v32 = vadd.f32 %v965_v43, %v905_v47  ;;  %508 = vst [vmem:[#allocation2 + $0xd9] sm:$0x3f] %v479_v0  ;;  %v969_v43 = vmul.f32 %v2078_v38, %v675_v30  ;;  %v621_v60 = vmul.f32 %v1983_v41, %v2016_v62  ;;  %v883_v56 = vmul.f32 %v1989_v45, %v2016_v62 }
  0x57   : > { %v995_v25 = vadd.f32 %v967_v17, %v907_v12  ;;  %v821_v37 = vadd.f32 %v793_v28, %v733_v16  ;;  %v735_v46 = vadd.f32 %v707_v40, %v647_v31  ;;  %v1058_v33 = vmul.f32 %v2083_v48, %v529_v44  ;;  %v514_v40 = vld [vmem:[#allocation2 + $0x8] sm:$0x3f] }
  0x58   : > { %v2092_v61 = vadd.f32 %v1054_v55, %v993_v32  ;;  %v2139_v32 = vld [vmem:[%s1967_s20 + $0x8] ss:$0 sm:$0xff]  ;;  %v795_v55 = vmul.f32 %v2055_v15, %v529_v44  ;;  %v1146_v4 = vmul.f32 %v2040_v7, %v2016_v62  ;;  %v649_v6 = vadd.f32 %v621_v60, %v561_v53  ;;  %v574_v44 = vld [vmem:[#allocation2 + $0x9] sm:$0x3f] }
  0x59   : > { %v1084_v39 = vadd.f32 %v1056_v35, %v995_v25  ;;  %v909_v42 = vadd.f32 %v881_v29, %v821_v37  ;;  %v1232_v1 = vmul.f32 %v2139_v32, %v675_v30  ;;  %v709_v16 = vmul.f32 %v2032_v2, %v677_v57  ;;  %v531_v25 = vld [vmem:[#allocation2 + $0x90] sm:$0xff]  ;;  %v520_v53 = vld [vmem:[#allocation2 + $0x38] sm:$0x3f] }
  0x5a   : > { %2884 = vst [vmem:[#allocation11_spill] sm:$0xff] %v2092_v61  ;;  %v823_v9 = vadd.f32 %v795_v55, %v735_v46  ;;  %v971_v0 = vmul.f32 %v2078_v38, %v677_v57  ;;  %v1234_v27 = vmul.f32 %v2139_v32, %v677_v57  ;;  %v563_v28 = vmul.f32 %v2020_v63, %v531_v25  ;;  %v518_v46 = vld [vmem:[#allocation2 + $0x28] sm:$0x3f]  ;;  %v930_v61 = vld [vmem:[#allocation2 + $0x3a] sm:$0x3f] }
  0x5b   : > { %v1172_v47 = vadd.f32 %v1144_v36, %v1084_v39  ;;  %v997_v52 = vadd.f32 %v969_v43, %v909_v42  ;;  %v737_v21 = vadd.f32 %v709_v16, %v649_v6  ;;  %v623_v29 = vmul.f32 %v1983_v41, %v2096_v5  ;;  %v679_v36 = vld [vmem:[#allocation2 + $0x92] sm:$0xff] }
  0x5c   : > { %v911_v17 = vadd.f32 %v883_v56, %v823_v9  ;;  %v797_v30 = vmul.f32 %v2055_v15, %v531_v25  ;;  %v885_v31 = vmul.f32 %v1989_v45, %v2096_v5  ;;  %v1060_v35 = vmul.f32 %v2083_v48, %v531_v25  ;;  %v580_v56 = vld [vmem:[#allocation2 + $0x39] sm:$0x3f] }
  0x5d   : > { %v2148_v58 = vadd.f32 %v1232_v1, %v1172_v47  ;;  %v1086_v12 = vadd.f32 %v1058_v33, %v997_v52  ;;  %v651_v37 = vadd.f32 %v623_v29, %v563_v28  ;;  %v1148_v39 = vmul.f32 %v2040_v7, %v2096_v5  ;;  %v1216_v47 = vld [vmem:[#allocation2 + $0xf2] sm:$0xff]  ;;  %v578_v1 = vld [vmem:[#allocation2 + $0x29] sm:$0x3f] }
  0x5e   : > { %v999_v26 = vadd.f32 %v971_v0, %v911_v17  ;;  %v825_v42 = vadd.f32 %v797_v30, %v737_v21  ;;  %v711_v52 = vmul.f32 %v2032_v2, %v679_v36  ;;  %v973_v33 = vmul.f32 %v2078_v38, %v679_v36  ;;  %v516_v16 = vld [vmem:[#allocation2 + $0x18] sm:$0x3f] }
  0x5f   : > { %2885 = vst [vmem:[#allocation12_spill] sm:$0xff] %v2148_v58  ;;  %v1174_v18 = vadd.f32 %v1146_v4, %v1086_v12  ;;  %v533_v4 = vld [vmem:[#allocation2 + $0xa0] sm:$0xff]  ;;  %v2170_v6 = vmul.f32 %v2020_v63, %v514_v40  ;;  %v2173_v5 = vmul.f32 %v1983_v41, %v574_v44  ;;  %v2176_v9 = vmul.f32 %v2139_v32, %v1216_v47  ;;  %v576_v25 = vld [vmem:[#allocation2 + $0x19] sm:$0x3f]  ;;  %v522_v44 = vld [vmem:[#allocation2 + $0x48] sm:$0x3f] }
  0x60   : > { %v1088_v43 = vadd.f32 %v1060_v35, %v999_v26  ;;  %v913_v60 = vadd.f32 %v885_v31, %v825_v42  ;;  %v739_v57 = vadd.f32 %v711_v52, %v651_v37  ;;  %v550_v12 = vmul.f32 %v2020_v63, %v518_v46  ;;  %v666_v26 = vld [vmem:[#allocation2 + $0x2a] sm:$0x3f]  ;;  %v668_v31 = vld [vmem:[#allocation2 + $0x3a] sm:$0x3f]  ;;  %v681_v40 = vld [vmem:[#allocation2 + $0xa2] sm:$0xff] }
  0x61   : > { %v2159_v62 = vadd.f32 %v1234_v27, %v1174_v18  ;;  %v610_v17 = vmul.f32 %v1983_v41, %v578_v1  ;;  %v552_v18 = vmul.f32 %v2020_v63, %v520_v53  ;;  %v1236_v0 = vmul.f32 %v2139_v32, %v679_v36  ;;  %v515_v42 = vld [vmem:[#allocation2 + $0x10] sm:$0xff]  ;;  %v582_v47 = vld [vmem:[#allocation2 + $0x49] sm:$0x3f] }
  0x62   : > { %v1176_v55 = vadd.f32 %v1148_v39, %v1088_v43  ;;  %v1001_v21 = vadd.f32 %v973_v33, %v913_v60  ;;  %v612_v27 = vmul.f32 %v1983_v41, %v580_v56  ;;  %v565_v28 = vmul.f32 %v2020_v63, %v533_v4  ;;  %v1128_v53 = vld [vmem:[#allocation2 + $0xf1] sm:$0xff] }
  0x63   : > { %2886 = vst [vmem:[#allocation13_spill] sm:$0xff] %v2159_v62  ;;  %v625_v29 = vmul.f32 %v1983_v41, %v2101_v8  ;;  %v799_v30 = vmul.f32 %v2055_v15, %v533_v4  ;;  %v2188_v35 = vmul.f32 0.0, %v2083_v48  ;;  %v887_v36 = vmul.f32 %v1989_v45, %v2101_v8 }
  0x64   : > { %v2190_v37 = vadd.f32 %v1236_v0, %v1176_v55  ;;  %v1062_v39 = vmul.f32 %v2083_v48, %v533_v4  ;;  %v548_v43 = vmul.f32 %v2020_v63, %v516_v16  ;;  %v1150_v1 = vmul.f32 %v2040_v7, %v2101_v8  ;;  %v663_v55 = vld [vmem:[#allocation2 + $0x12] sm:$0xff]  ;;  %v664_v4 = vld [vmem:[#allocation2 + $0x1a] sm:$0x3f] }
  0x65   : > { %v653_v46 = vadd.f32 %v625_v29, %v565_v28  ;;  %v827_v52 = vadd.f32 %v799_v30, %v739_v57  ;;  %v608_v60 = vmul.f32 %v1983_v41, %v576_v25  ;;  %v638_v56 = vadd.f32 %v610_v17, %v550_v12  ;;  %v756_v29 = vld [vmem:[#allocation2 + $0x48] sm:$0x3f] }
  0x66   : > { %2887 = vst [vmem:[#allocation14_spill] sm:$0xff] %v2190_v37  ;;  %v698_v33 = vmul.f32 %v2032_v2, %v666_v26  ;;  %v1090_v0 = vadd.f32 %v1062_v39, %v1001_v21  ;;  %v640_v62 = vadd.f32 %v612_v27, %v552_v18  ;;  %v700_v16 = vmul.f32 %v2032_v2, %v668_v31  ;;  %v754_v21 = vld [vmem:[#allocation2 + $0x38] sm:$0x3f]  ;;  %v670_v26 = vld [vmem:[#allocation2 + $0x4a] sm:$0x3f]  ;;  %v535_v31 = vld [vmem:[#allocation2 + $0xb0] sm:$0xff] }
  0x67   : > { %v915_v58 = vadd.f32 %v887_v36, %v827_v52  ;;  %v713_v28 = vmul.f32 %v2032_v2, %v681_v40  ;;  %v2203_v57 = vmul.f32 %v2020_v63, %v515_v42  ;;  %v554_v8 = vmul.f32 %v2020_v63, %v522_v44 }
  0x68   : > { %v614_v25 = vmul.f32 %v1983_v41, %v582_v47  ;;  %v1178_v12 = vadd.f32 %v1150_v1, %v1090_v0  ;;  %v2208_v17 = vmul.f32 %v2032_v2, %v663_v55  ;;  %v2211_v18 = vmul.f32 %v2040_v7, %v1128_v53  ;;  %v526_v1 = vld [vmem:[#allocation2 + $0x68] sm:$0x3f] }
  0x69   : > { %v741_v27 = vadd.f32 %v713_v28, %v653_v46  ;;  %v975_v30 = vmul.f32 %v2078_v38, %v681_v40  ;;  %v2214_v36 = vadd.f32 %v608_v60, %v548_v43  ;;  %v2217_v39 = vmul.f32 %v2032_v2, %v664_v4  ;;  %v586_v55 = vld [vmem:[#allocation2 + $0x69] sm:$0x3f] }
  0x6a   : > { %v726_v42 = vadd.f32 %v698_v33, %v638_v56  ;;  %v2220_v44 = vmul.f32 %v2055_v15, %v752_v49  ;;  %v728_v47 = vadd.f32 %v700_v16, %v640_v62  ;;  %v788_v52 = vmul.f32 %v2055_v15, %v756_v29  ;;  %v844_v60 = vld [vmem:[#allocation2 + $0x49] sm:$0x3f]  ;;  %v524_v56 = vld [vmem:[#allocation2 + $0x58] sm:$0x3f] }
  0x6b   : > { %v1003_v53 = vadd.f32 %v975_v30, %v915_v58  ;;  %v1238_v46 = vmul.f32 %v2139_v32, %v681_v40  ;;  %v786_v0 = vmul.f32 %v2055_v15, %v754_v21  ;;  %v642_v28 = vadd.f32 %v614_v25, %v554_v8  ;;  %v584_v33 = vld [vmem:[#allocation2 + $0x59] sm:$0x3f] }
  0x6c   : > { %v702_v43 = vmul.f32 %v2032_v2, %v670_v26  ;;  %v567_v4 = vmul.f32 %v2020_v63, %v535_v31  ;;  %v627_v62 = vmul.f32 %v1983_v41, %v2105_v59  ;;  %v801_v16 = vmul.f32 %v2055_v15, %v535_v31  ;;  %v683_v40 = vld [vmem:[#allocation2 + $0xb2] sm:$0xff] }
  0x6d   : > { %v2227_v49 = vadd.f32 %v1238_v46, %v1178_v12  ;;  %v889_v58 = vmul.f32 %v1989_v45, %v2105_v59  ;;  %v758_v29 = vld [vmem:[#allocation2 + $0x58] sm:$0x3f]  ;;  %v558_v8 = vmul.f32 %v2020_v63, %v526_v1  ;;  %v618_v25 = vmul.f32 %v1983_v41, %v586_v55 }
  0x6e   : > { %v1064_v21 = vmul.f32 %v2083_v48, %v535_v31  ;;  %v1152_v12 = vmul.f32 %v2040_v7, %v2105_v59  ;;  %v842_v26 = vld [vmem:[#allocation2 + $0x39] sm:$0x3f]  ;;  %v816_v30 = vadd.f32 %v788_v52, %v728_v47  ;;  %v876_v46 = vmul.f32 %v1989_v45, %v844_v60 }
  0x6f   : > { %2888 = vst [vmem:[#allocation15_spill] sm:$0xff] %v2227_v49  ;;  %v674_v49 = vld [vmem:[#allocation2 + $0x6a] sm:$0x3f]  ;;  %v655_v37 = vadd.f32 %v627_v62, %v567_v4  ;;  %v829_v11 = vadd.f32 %v801_v16, %v741_v27  ;;  %v556_v34 = vmul.f32 %v2020_v63, %v524_v56  ;;  %v616_v13 = vmul.f32 %v1983_v41, %v584_v33  ;;  %v672_v47 = vld [vmem:[#allocation2 + $0x5a] sm:$0x3f] }
  0x70   : > { %v1092_v1 = vadd.f32 %v1064_v21, %v1003_v53  ;;  %v715_v55 = vmul.f32 %v2032_v2, %v683_v40  ;;  %v2245_v31 = vmul.f32 %v2055_v15, %v2043_v10  ;;  %v730_v59 = vadd.f32 %v702_v43, %v642_v28  ;;  %v846_v4 = vld [vmem:[#allocation2 + $0x59] sm:$0x3f]  ;;  %v537_v43 = vld [vmem:[#allocation2 + $0xc0] sm:$0xff] }
  0x71   : > { %v790_v52 = vmul.f32 %v2055_v15, %v758_v29  ;;  %v917_v60 = vadd.f32 %v889_v58, %v829_v11  ;;  %v2249_v27 = vmul.f32 %v1989_v45, %v842_v26  ;;  %v646_v56 = vadd.f32 %v618_v25, %v558_v8  ;;  %v762_v26 = vld [vmem:[#allocation2 + $0x78] sm:$0x3f] }
  0x72   : > { %v706_v33 = vmul.f32 %v2032_v2, %v674_v49  ;;  %v1180_v53 = vadd.f32 %v1152_v12, %v1092_v1  ;;  %v2252_v62 = vadd.f32 %v786_v0, %v726_v42  ;;  %v2255_v16 = vmul.f32 %v2078_v38, %v930_v61  ;;  %v934_v25 = vld [vmem:[#allocation2 + $0x5a] sm:$0x3f]  ;;  %v760_v12 = vld [vmem:[#allocation2 + $0x68] sm:$0x3f] }
  0x73   : > { %2889 = vst [vmem:[#allocation16_spill] sm:$0xff] %v2249_v27  ;;  %v743_v10 = vadd.f32 %v715_v55, %v655_v37  ;;  %v977_v28 = vmul.f32 %v2078_v38, %v683_v40  ;;  %v904_v21 = vadd.f32 %v876_v46, %v816_v30  ;;  %v964_v11 = vmul.f32 %v2078_v38, %v932_v54 }
  0x74   : > { %2890 = vst [vmem:[#allocation17_spill] sm:$0xff] %v2255_v16  ;;  %v644_v58 = vadd.f32 %v616_v13, %v556_v34  ;;  %v704_v29 = vmul.f32 %v2032_v2, %v672_v47  ;;  %v818_v8 = vadd.f32 %v790_v52, %v730_v59  ;;  %v878_v49 = vmul.f32 %v1989_v45, %v846_v4  ;;  %v528_v13 = vld [vmem:[#allocation2 + $0x78] sm:$0x3f]  ;;  %v685_v59 = vld [vmem:[#allocation2 + $0xc2] sm:$0xff] }
  0x75   : > { %v1005_v42 = vadd.f32 %v977_v28, %v917_v60  ;;  %v1240_v0 = vmul.f32 %v2139_v32, %v683_v40  ;;  %v734_v61 = vadd.f32 %v706_v33, %v646_v56  ;;  %v569_v37 = vmul.f32 %v2020_v63, %v537_v43  ;;  %v588_v34 = vld [vmem:[#allocation2 + $0x79] sm:$0x3f] }
  0x76   : > { %v629_v30 = vmul.f32 %v1983_v41, %v2114_v20  ;;  %v803_v54 = vmul.f32 %v2055_v15, %v537_v43  ;;  %v794_v46 = vmul.f32 %v2055_v15, %v762_v26  ;;  %v891_v55 = vmul.f32 %v1989_v45, %v2114_v20  ;;  %v850_v52 = vld [vmem:[#allocation2 + $0x79] sm:$0x3f] }
  0x77   : > { %v2267_v1 = vadd.f32 %v1240_v0, %v1180_v53  ;;  %v1066_v40 = vmul.f32 %v2083_v48, %v537_v43  ;;  %v966_v47 = vmul.f32 %v2078_v38, %v934_v25  ;;  %v1154_v56 = vmul.f32 %v2040_v7, %v2114_v20  ;;  %v1021_v0 = vld [vmem:[#allocation2 + $0x58] sm:$0x3f] }
  0x78   : > { %v657_v60 = vadd.f32 %v629_v30, %v569_v37  ;;  %v831_v4 = vadd.f32 %v803_v54, %v743_v10  ;;  %v732_v33 = vadd.f32 %v704_v29, %v644_v58  ;;  %v906_v28 = vadd.f32 %v878_v49, %v818_v8  ;;  %v676_v37 = vld [vmem:[#allocation2 + $0x7a] sm:$0x3f] }
  0x79   : > { %2891 = vst [vmem:[#allocation18_spill] sm:$0xff] %v2267_v1  ;;  %v792_v26 = vmul.f32 %v2055_v15, %v760_v12  ;;  %v1094_v53 = vadd.f32 %v1066_v40, %v1005_v42  ;;  %v848_v1 = vld [vmem:[#allocation2 + $0x69] sm:$0x3f]  ;;  %v560_v16 = vmul.f32 %v2020_v63, %v528_v13  ;;  %v620_v43 = vmul.f32 %v1983_v41, %v588_v34  ;;  %v938_v12 = vld [vmem:[#allocation2 + $0x7a] sm:$0x3f] }
  0x7a   : > { %v919_v27 = vadd.f32 %v891_v55, %v831_v4  ;;  %v717_v25 = vmul.f32 %v2032_v2, %v685_v59  ;;  %v2281_v10 = vmul.f32 %v2078_v38, %v2059_v19  ;;  %v822_v20 = vadd.f32 %v794_v46, %v734_v61  ;;  %v936_v42 = vld [vmem:[#allocation2 + $0x6a] sm:$0x3f]  ;;  %v539_v46 = vld [vmem:[#allocation2 + $0xd0] sm:$0xff] }
  0x7b   : > { %v882_v58 = vmul.f32 %v1989_v45, %v850_v52  ;;  %v1182_v29 = vadd.f32 %v1154_v56, %v1094_v53  ;;  %v2284_v8 = vadd.f32 %v964_v11, %v904_v21  ;;  %v2288_v49 = vmul.f32 %v2083_v48, %v2063_v23  ;;  %v1023_v55 = vld [vmem:[#allocation2 + $0x68] sm:$0x3f]  ;;  %v1109_v53 = vld [vmem:[#allocation2 + $0x59] sm:$0x3f] }
  0x7c   : > { %v745_v30 = vadd.f32 %v717_v25, %v657_v60  ;;  %v979_v54 = vmul.f32 %v2078_v38, %v685_v59  ;;  %v994_v13 = vadd.f32 %v966_v47, %v906_v28  ;;  %v2292_v19 = vmul.f32 %v2083_v48, %v1021_v0  ;;  %v530_v47 = vld [vmem:[#allocation2 + $0x88] sm:$0x3f] }
  0x7d   : > { %2892 = vst [vmem:[#allocation19_spill] sm:$0xff] %v2284_v8  ;;  %2893 = vst [vmem:[#allocation20_spill] sm:$0xff] %v2288_v49  ;;  %v820_v34 = vadd.f32 %v792_v26, %v732_v33  ;;  %v880_v61 = vmul.f32 %v1989_v45, %v848_v1  ;;  %v648_v21 = vadd.f32 %v620_v43, %v560_v16  ;;  %v590_v28 = vld [vmem:[#allocation2 + $0x89] sm:$0x3f] }
  0x7e   : > { %2894 = vst [vmem:[#allocation21_spill] sm:$0xff] %v2292_v19  ;;  %v708_v11 = vmul.f32 %v2032_v2, %v676_v37  ;;  %v1007_v40 = vadd.f32 %v979_v54, %v919_v27  ;;  %v1242_v23 = vmul.f32 %v2139_v32, %v685_v59  ;;  %v968_v52 = vmul.f32 %v2078_v38, %v936_v42  ;;  %v764_v33 = vld [vmem:[#allocation2 + $0x88] sm:$0x3f]  ;;  %v687_v59 = vld [vmem:[#allocation2 + $0xd2] sm:$0xff] }
  0x7f   : > { %v910_v60 = vadd.f32 %v882_v58, %v822_v20  ;;  %v970_v4 = vmul.f32 %v2078_v38, %v938_v12  ;;  %v571_v56 = vmul.f32 %v2020_v63, %v539_v46  ;;  %v631_v16 = vmul.f32 %v1983_v41, %v2119_v22  ;;  %v1027_v25 = vld [vmem:[#allocation2 + $0x88] sm:$0x3f] }
  0x80   : > { %v2300_v26 = vadd.f32 %v1242_v23, %v1182_v29  ;;  %v805_v1 = vmul.f32 %v2055_v15, %v539_v46  ;;  %v893_v27 = vmul.f32 %v1989_v45, %v2119_v22  ;;  %v908_v0 = vadd.f32 %v880_v61, %v820_v34  ;;  %v1111_v58 = vld [vmem:[#allocation2 + $0x69] sm:$0x3f]  ;;  %v1025_v23 = vld [vmem:[#allocation2 + $0x78] sm:$0x3f] }
  0x81   : > { %v1055_v43 = vmul.f32 %v2083_v48, %v1023_v55  ;;  %v1068_v37 = vmul.f32 %v2083_v48, %v539_v46  ;;  %v1156_v20 = vmul.f32 %v2040_v7, %v2119_v22  ;;  %v736_v29 = vadd.f32 %v708_v11, %v648_v21  ;;  %v678_v8 = vld [vmem:[#allocation2 + $0x8a] sm:$0x3f] }
  0x82   : > { %2895 = vst [vmem:[#allocation22_spill] sm:$0xff] %v2300_v26  ;;  %v562_v42 = vmul.f32 %v2020_v63, %v530_v47  ;;  %v659_v12 = vadd.f32 %v631_v16, %v571_v56  ;;  %v833_v54 = vadd.f32 %v805_v1, %v745_v30  ;;  %v622_v26 = vmul.f32 %v1983_v41, %v590_v28  ;;  %v852_v22 = vld [vmem:[#allocation2 + $0x89] sm:$0x3f]  ;;  %v1113_v1 = vld [vmem:[#allocation2 + $0x79] sm:$0x3f] }
  0x83   : > { %v796_v19 = vmul.f32 %v2055_v15, %v764_v33  ;;  %v1096_v34 = vadd.f32 %v1068_v37, %v1007_v40  ;;  %v719_v61 = vmul.f32 %v2032_v2, %v687_v59  ;;  %v2316_v55 = vmul.f32 %v2040_v7, %v1109_v53  ;;  %v1115_v28 = vld [vmem:[#allocation2 + $0x89] sm:$0x3f] }
  0x84   : > { %v998_v46 = vadd.f32 %v970_v4, %v910_v60  ;;  %v1059_v21 = vmul.f32 %v2083_v48, %v1027_v25  ;;  %v921_v11 = vadd.f32 %v893_v27, %v833_v54  ;;  %v1083_v47 = vadd.f32 %v1055_v43, %v994_v13  ;;  %v775_v4 = vld [vmem:[#allocation2 + $0xe0] sm:$0xff]  ;;  %v940_v25 = vld [vmem:[#allocation2 + $0x8a] sm:$0x3f] }
  0x85   : > { %2896 = vst [vmem:[#allocation23_spill] sm:$0xff] %v2316_v55  ;;  %v1143_v30 = vmul.f32 %v2040_v7, %v1111_v58  ;;  %v2322_v56 = vmul.f32 %v2139_v32, %v2085_v51  ;;  %v1184_v40 = vadd.f32 %v1156_v20, %v1096_v34  ;;  %v996_v33 = vadd.f32 %v968_v52, %v908_v0  ;;  %v1203_v20 = vld [vmem:[#allocation2 + $0x8a] sm:$0x3f]  ;;  %v532_v34 = vld [vmem:[#allocation2 + $0x98] sm:$0x3f] }
  0x86   : > { %v1057_v16 = vmul.f32 %v2083_v48, %v1025_v23  ;;  %v747_v53 = vadd.f32 %v719_v61, %v659_v12  ;;  %v981_v60 = vmul.f32 %v2078_v38, %v687_v59  ;;  %v650_v37 = vadd.f32 %v622_v26, %v562_v42  ;;  %v766_v12 = vld [vmem:[#allocation2 + $0x98] sm:$0x3f] }
  0x87   : > { %2897 = vst [vmem:[#allocation24_spill] sm:$0xff] %v2322_v56  ;;  %v710_v27 = vmul.f32 %v2032_v2, %v678_v8  ;;  %v824_v13 = vadd.f32 %v796_v19, %v736_v29  ;;  %v884_v43 = vmul.f32 %v1989_v45, %v852_v22  ;;  %v1087_v58 = vadd.f32 %v1059_v21, %v998_v46  ;;  %v951_v19 = vld [vmem:[#allocation2 + $0xe2] sm:$0xff]  ;;  %v592_v61 = vld [vmem:[#allocation2 + $0x99] sm:$0x3f]  ;;  %v1199_v22 = vld [vmem:[#allocation2 + $0x6a] sm:$0x3f] }
  0x88   : > { %v1147_v51 = vmul.f32 %v2040_v7, %v1115_v28  ;;  %v1009_v54 = vadd.f32 %v981_v60, %v921_v11  ;;  %v1244_v52 = vmul.f32 %v2139_v32, %v687_v59  ;;  %v1145_v0 = vmul.f32 %v2040_v7, %v1113_v1  ;;  %v1201_v21 = vld [vmem:[#allocation2 + $0x7a] sm:$0x3f]  ;;  %v573_v56 = vld [vmem:[#allocation2 + $0x1] sm:$0xff] }
  0x89   : > { %v807_v23 = vmul.f32 %v2055_v15, %v775_v4  ;;  %v895_v26 = vmul.f32 %v1989_v45, %v2123_v24  ;;  %v1070_v8 = vmul.f32 %v2083_v48, %v775_v4  ;;  %v1085_v29 = vadd.f32 %v1057_v16, %v996_v33  ;;  %v854_v16 = vld [vmem:[#allocation2 + $0x99] sm:$0x3f] }
  0x8a   : > { %v972_v42 = vmul.f32 %v2078_v38, %v940_v25  ;;  %v2336_v46 = vadd.f32 %v1244_v52, %v1184_v40  ;;  %v1158_v59 = vmul.f32 %v2040_v7, %v2123_v24  ;;  %v738_v11 = vadd.f32 %v710_v27, %v650_v37  ;;  %v680_v27 = vld [vmem:[#allocation2 + $0x9a] sm:$0x3f] }
  0x8b   : > { %v912_v28 = vadd.f32 %v884_v43, %v824_v13  ;;  %v835_v1 = vadd.f32 %v807_v23, %v747_v53  ;;  %v1098_v60 = vadd.f32 %v1070_v8, %v1009_v54  ;;  %v1175_v55 = vadd.f32 %v1147_v51, %v1087_v58  ;;  %v942_v54 = vld [vmem:[#allocation2 + $0x9a] sm:$0x3f] }
  0x8c   : > { %2898 = vst [vmem:[#allocation25_spill] sm:$0xff] %v2336_v46  ;;  %v1235_v4 = vmul.f32 %v2139_v32, %v1203_v20  ;;  %v798_v33 = vmul.f32 %v2055_v15, %v766_v12  ;;  %v983_v25 = vmul.f32 %v2078_v38, %v951_v19  ;;  %v564_v40 = vmul.f32 %v2020_v63, %v532_v34  ;;  %v662_v12 = vld [vmem:[#allocation2 + $0xa] sm:$0x3f]  ;;  %v661_v34 = vld [vmem:[#allocation2 + $0x2] sm:$0xff] }
  0x8d   : > { %v624_v52 = vmul.f32 %v1983_v41, %v592_v61  ;;  %v923_v46 = vadd.f32 %v895_v26, %v835_v1  ;;  %v1186_v24 = vadd.f32 %v1158_v59, %v1098_v60  ;;  %v2345_v49 = vadd.f32 %v1143_v30, %v1083_v47  ;;  %v1029_v26 = vld [vmem:[#allocation2 + $0x98] sm:$0x3f] }
  0x8e   : > { %v2348_v53 = vmul.f32 %v2139_v32, %v1199_v22  ;;  %v1233_v37 = vmul.f32 %v2139_v32, %v1201_v21  ;;  %v1246_v13 = vmul.f32 %v2139_v32, %v951_v19  ;;  %v1173_v43 = vadd.f32 %v1145_v0, %v1085_v29  ;;  %v749_v29 = vld [vmem:[#allocation2 + $0x10] sm:$0xff]  ;;  %v750_v1 = vld [vmem:[#allocation2 + $0x18] sm:$0x3f] }
  0x8f   : > { %v1000_v58 = vadd.f32 %v972_v42, %v912_v28  ;;  %v886_v51 = vmul.f32 %v1989_v45, %v854_v16  ;;  %v1011_v20 = vadd.f32 %v983_v25, %v923_v46  ;;  %v826_v23 = vadd.f32 %v798_v33, %v738_v11  ;;  %v1117_v60 = vld [vmem:[#allocation2 + $0x99] sm:$0x3f] }
  0x90   : > { %v2353_v8 = vadd.f32 %v1246_v13, %v1186_v24  ;;  %v545_v47 = vmul.f32 0.0, %v2020_v63  ;;  %v605_v30 = vmul.f32 %v1983_v41, %v573_v56  ;;  %v2357_v61 = vadd.f32 %v1235_v4, %v1175_v55  ;;  %v1205_v4 = vld [vmem:[#allocation2 + $0x9a] sm:$0x3f]  ;;  %v2388_v24 = vld [vmem:[#allocation2 + $0x21] sm:$0xff] }
  0x91   : > { %v652_v59 = vadd.f32 %v624_v52, %v564_v40  ;;  %v712_v0 = vmul.f32 %v2032_v2, %v680_v27  ;;  %v1100_v19 = vadd.f32 %v2188_v35, %v1011_v20  ;;  %v974_v42 = vmul.f32 %v2078_v38, %v942_v54  ;;  %v838_v52 = vld [vmem:[#allocation2 + $0x19] sm:$0x3f] }
  0x92   : > { %v633_v46 = vadd.f32 %v605_v30, %v545_v47  ;;  %v634_v22 = vadd.f32 %v2173_v5, %v2170_v6  ;;  %v635_v21 = vadd.f32 %v1998_v50, %v2203_v57  ;;  %v1061_v56 = vmul.f32 %v2083_v48, %v1029_v26  ;;  %v925_v54 = vld [vmem:[#allocation2 + $0x12] sm:$0xff] }
  0x93   : > { %v1188_v55 = vadd.f32 %v2211_v18, %v1100_v19  ;;  %v693_v11 = vmul.f32 %v2032_v2, %v661_v34  ;;  %v694_v28 = vmul.f32 %v2032_v2, %v662_v12  ;;  %v914_v35 = vadd.f32 %v886_v51, %v826_v23  ;;  %v926_v34 = vld [vmem:[#allocation2 + $0x1a] sm:$0x3f] }
  0x94   : > { %v723_v33 = vadd.f32 %v2208_v17, %v635_v21  ;;  %v724_v6 = vadd.f32 %v2217_v39, %v2214_v36  ;;  %v781_v5 = vmul.f32 %v2055_v15, %v749_v29  ;;  %v2374_v50 = vadd.f32 %v1233_v37, %v1173_v43  ;;  %v837_v39 = vld [vmem:[#allocation2 + $0x11] sm:$0xff]  ;;  %v840_v37 = vld [vmem:[#allocation2 + $0x29] sm:$0x3f] }
  0x95   : > { %v2378_v57 = vmul.f32 %v2357_v61, %v2357_v61  ;;  %v2381_v18 = vadd.f32 %v2176_v9, %v1188_v55  ;;  %v721_v16 = vadd.f32 %v693_v11, %v633_v46  ;;  %v2383_v25 = vadd.f32 %v712_v0, %v652_v59  ;;  %v534_v43 = vld [vmem:[#allocation2 + $0xa8] sm:$0x3f]  ;;  %v1014_v11 = vld [vmem:[#allocation2 + $0x20] sm:$0xff] }
  0x96   : > { %v722_v40 = vadd.f32 %v694_v28, %v634_v22  ;;  %v782_v17 = vmul.f32 %v2055_v15, %v750_v1  ;;  %v783_v36 = vmul.f32 %v2055_v15, %v2034_v3  ;;  %v2390_v27 = vadd.f32 %v1061_v56, %v1000_v58  ;;  %v2407_v59 = vld [vmem:[#allocation2 + $0x22] sm:$0xff]  ;;  %v928_v0 = vld [vmem:[#allocation2 + $0x2a] sm:$0x3f] }
  0x97   : > { %v2393_v13 = vmul.f32 %v2040_v7, %v1117_v60  ;;  %v2396_v9 = vmul.f32 %v2139_v32, %v1205_v4  ;;  %v809_v51 = vadd.f32 %v781_v5, %v721_v16  ;;  %v2398_v20 = vadd.f32 %v974_v42, %v914_v35  ;;  %v768_v29 = vld [vmem:[#allocation2 + $0xa8] sm:$0x3f]  ;;  %v2899_v42 = vld [vmem:[#allocation16_spill] sm:$0xff]  ;;  %v2901_v5 = vld [vmem:[#allocation9_spill] sm:$0xff] }
  0x98   : > { %v810_v12 = vadd.f32 %v782_v17, %v722_v40  ;;  %v811_v3 = vadd.f32 %v783_v36, %v723_v33  ;;  %v812_v23 = vadd.f32 %v2220_v44, %v724_v6  ;;  %v813_v26 = vadd.f32 %v2245_v31, %v2052_v14  ;;  %v2900_v56 = vld [vmem:[#allocation7_spill] sm:$0xff]  ;;  %v1016_v33 = vld [vmem:[#allocation2 + $0x30] sm:$0xff]  ;;  %v1017_v6 = vld [vmem:[#allocation2 + $0x38] sm:$0x3f] }
  0x99   : > { %v869_v58 = vmul.f32 %v1989_v45, %v837_v39  ;;  %v870_v47 = vmul.f32 %v1989_v45, %v838_v52  ;;  %v871_v30 = vmul.f32 %v1989_v45, %v2388_v24  ;;  %v2410_v19 = vmul.f32 %v2020_v63, %v534_v43  ;;  %v1015_v4 = vld [vmem:[#allocation2 + $0x28] sm:$0x3f]  ;;  %v2902_v17 = vld [vmem:[#allocation10_spill] sm:$0xff] }
  0x9a   : > { %v872_v44 = vmul.f32 %v1989_v45, %v840_v37  ;;  %v902_v14 = vadd.f32 %v2899_v42, %v2252_v62  ;;  %v957_v31 = vmul.f32 %v2078_v38, %v925_v54  ;;  %v901_v55 = vadd.f32 %v2900_v56, %v813_v26  ;;  %v1018_v39 = vld [vmem:[#allocation2 + $0x40] sm:$0xff]  ;;  %v1019_v52 = vld [vmem:[#allocation2 + $0x48] sm:$0x3f] }
  0x9b   : > { %v897_v46 = vadd.f32 %v869_v58, %v809_v51  ;;  %v898_v22 = vadd.f32 %v870_v47, %v810_v12  ;;  %v899_v21 = vadd.f32 %v871_v30, %v811_v3  ;;  %v958_v1 = vmul.f32 %v2078_v38, %v926_v34  ;;  %v594_v12 = vld [vmem:[#allocation2 + $0xa9] sm:$0x3f]  ;;  %v2903_v34 = vld [vmem:[#allocation17_spill] sm:$0xff] }
  0x9c   : > { %v900_v28 = vadd.f32 %v872_v44, %v812_v23  ;;  %v959_v35 = vmul.f32 %v2078_v38, %v2407_v59  ;;  %v960_v60 = vmul.f32 %v2078_v38, %v928_v0  ;;  %v800_v62 = vmul.f32 %v2055_v15, %v768_v29  ;;  %v856_v3 = vld [vmem:[#allocation2 + $0xa9] sm:$0x3f]  ;;  %v2904_v44 = vld [vmem:[#allocation20_spill] sm:$0xff] }
  0x9d   : > { %v961_v16 = vmul.f32 %v2078_v38, %v2901_v5  ;;  %v985_v40 = vadd.f32 %v957_v31, %v897_v46  ;;  %v991_v36 = vadd.f32 %v2281_v10, %v2902_v17  ;;  %v986_v37 = vadd.f32 %v958_v1, %v898_v22  ;;  %v1103_v30 = vld [vmem:[#allocation2 + $0x29] sm:$0x3f]  ;;  %v1104_v31 = vld [vmem:[#allocation2 + $0x31] sm:$0xff]  ;;  %v1105_v46 = vld [vmem:[#allocation2 + $0x39] sm:$0x3f] }
  0x9e   : > { %v987_v43 = vadd.f32 %v959_v35, %v899_v21  ;;  %v988_v51 = vadd.f32 %v960_v60, %v900_v28  ;;  %v1046_v54 = vmul.f32 %v2083_v48, %v1014_v11  ;;  %v1047_v26 = vmul.f32 %v2083_v48, %v1015_v4  ;;  %v1106_v22 = vld [vmem:[#allocation2 + $0x41] sm:$0xff]  ;;  %v1107_v4 = vld [vmem:[#allocation2 + $0x49] sm:$0x3f]  ;;  %v1790_v17 = vld [vmem:[#allocation2 + $0x51] sm:$0xff] }
  0x9f   : > { %v989_v23 = vadd.f32 %v961_v16, %v901_v55  ;;  %v1048_v58 = vmul.f32 %v2083_v48, %v1016_v33  ;;  %v1049_v47 = vmul.f32 %v2083_v48, %v1017_v6  ;;  %v990_v10 = vadd.f32 %v2903_v34, %v902_v14  ;;  %v1191_v16 = vld [vmem:[#allocation2 + $0x2a] sm:$0x3f] }
  0xa0   : > { %v1050_v0 = vmul.f32 %v2083_v48, %v1018_v39  ;;  %v1074_v29 = vadd.f32 %v1046_v54, %v985_v40  ;;  %v1080_v42 = vadd.f32 %v2904_v44, %v991_v36  ;;  %v1051_v21 = vmul.f32 %v2083_v48, %v1019_v52 }
  0xa1   : > { %v1075_v56 = vadd.f32 %v1047_v26, %v986_v37  ;;  %v1076_v55 = vadd.f32 %v1048_v58, %v987_v43  ;;  %v1077_v11 = vadd.f32 %v1049_v47, %v988_v51  ;;  %v626_v28 = vmul.f32 %v1983_v41, %v594_v12  ;;  %v1193_v37 = vld [vmem:[#allocation2 + $0x3a] sm:$0x3f]  ;;  %v1194_v43 = vld [vmem:[#allocation2 + $0x42] sm:$0xff]  ;;  %v1196_v26 = vld [vmem:[#allocation2 + $0x52] sm:$0xff] }
  0xa2   : > { %v1078_v1 = vadd.f32 %v1050_v0, %v989_v23  ;;  %v1134_v35 = vmul.f32 %v2040_v7, %v2388_v24  ;;  %v1135_v14 = vmul.f32 %v2040_v7, %v1103_v30  ;;  %v888_v60 = vmul.f32 %v1989_v45, %v856_v3  ;;  %v1192_v24 = vld [vmem:[#allocation2 + $0x32] sm:$0xff]  ;;  %v1031_v51 = vld [vmem:[#allocation2 + $0xa8] sm:$0x3f] }
  0xa3   : > { %v1136_v33 = vmul.f32 %v2040_v7, %v1104_v31  ;;  %v1137_v6 = vmul.f32 %v2040_v7, %v1105_v46  ;;  %v1138_v5 = vmul.f32 %v2040_v7, %v1106_v22  ;;  %v828_v40 = vadd.f32 %v800_v62, %v2383_v25  ;;  %v2905_v47 = vld [vmem:[#allocation11_spill] sm:$0xff]  ;;  %v2906_v30 = vld [vmem:[#allocation8_spill] sm:$0xff] }
  0xa4   : > { %v1140_v36 = vmul.f32 %v1790_v17, %v2040_v7  ;;  %v1162_v39 = vadd.f32 %v1134_v35, %v1074_v29  ;;  %v1163_v52 = vadd.f32 %v1135_v14, %v1075_v56  ;;  %v1079_v54 = vadd.f32 %v1051_v21, %v990_v10  ;;  %v682_v0 = vld [vmem:[#allocation2 + $0xaa] sm:$0x3f] }
  0xa5   : > { %v1164_v12 = vadd.f32 %v1136_v33, %v1076_v55  ;;  %v1165_v3 = vadd.f32 %v1137_v6, %v1077_v11  ;;  %v1166_v23 = vadd.f32 %v1138_v5, %v1078_v1  ;;  %v1170_v34 = vadd.f32 %v2906_v30, %v2905_v47  ;;  %v944_v46 = vld [vmem:[#allocation2 + $0xaa] sm:$0x3f]  ;;  %v2907_v5 = vld [vmem:[#allocation24_spill] sm:$0xff] }
  0xa6   : > { %v1168_v58 = vadd.f32 %v1140_v36, %v1080_v42  ;;  %v1222_v25 = vmul.f32 %v2139_v32, %v2407_v59  ;;  %v1223_v62 = vmul.f32 %v2139_v32, %v1191_v16  ;;  %v1139_v29 = vmul.f32 %v2040_v7, %v1107_v4  ;;  %v1119_v55 = vld [vmem:[#allocation2 + $0xa9] sm:$0x3f] }
  0xa7   : > { %v1224_v44 = vmul.f32 %v2139_v32, %v1192_v24  ;;  %v1225_v10 = vmul.f32 %v2139_v32, %v1193_v37  ;;  %v1226_v31 = vmul.f32 %v2139_v32, %v1194_v43  ;;  %v1063_v42 = vmul.f32 %v2083_v48, %v1031_v51  ;;  %v1195_v33 = vld [vmem:[#allocation2 + $0x4a] sm:$0x3f] }
  0xa8   : > { %v1228_v22 = vmul.f32 %v2139_v32, %v1196_v26  ;;  %v2455_v21 = vadd.f32 %v1222_v25, %v1162_v39  ;;  %v2457_v56 = vadd.f32 %v1223_v62, %v1163_v52  ;;  %v1177_v59 = vadd.f32 %v2393_v13, %v2390_v27  ;;  %v536_v27 = vld [vmem:[#allocation2 + $0xb8] sm:$0x3f]  ;;  %v2908_v36 = vld [vmem:[#allocation19_spill] sm:$0xff] }
  0xa9   : > { %v2461_v11 = vadd.f32 %v1224_v44, %v1164_v12  ;;  %v2463_v1 = vadd.f32 %v1225_v10, %v1165_v3  ;;  %v2465_v35 = vadd.f32 %v1226_v31, %v1166_v23  ;;  %v654_v14 = vadd.f32 %v626_v28, %v2410_v19  ;;  %v596_v13 = vld [vmem:[#allocation2 + $0xb9] sm:$0x3f]  ;;  %v1207_v3 = vld [vmem:[#allocation2 + $0xaa] sm:$0x3f] }
  0xaa   : > { %v714_v4 = vmul.f32 %v2032_v2, %v682_v0  ;;  %v2469_v6 = vadd.f32 %v1228_v22, %v1168_v58  ;;  %v2472_v16 = vadd.f32 %v2907_v5, %v1170_v34  ;;  %v976_v17 = vmul.f32 %v2078_v38, %v944_v46  ;;  %v2909_v39 = vld [vmem:[#allocation21_spill] sm:$0xff]  ;;  %v2910_v25 = vld [vmem:[#allocation23_spill] sm:$0xff]  ;;  %v2911_v22 = vld [vmem:[#allocation14_spill] sm:$0xff] }
  0xab   : > { %v1081_v52 = vadd.f32 %v2909_v39, %v2908_v36  ;;  %v1167_v24 = vadd.f32 %v1139_v29, %v1079_v54  ;;  %v1279_v37 = vsel %vm1278_vm0, %v2457_v56, 0.0  ;;  %v1197_v19 = vld [vmem:[#allocation2 + $0x5a] sm:$0x3f]  ;;  %v916_v28 = vadd.f32 %v888_v60, %v828_v40 }
  0xac   : > { %v1091_v43 = vadd.f32 %v1063_v42, %v2398_v20  ;;  %v1151_v51 = vmul.f32 %v2040_v7, %v1119_v55  ;;  %v1280_v12 = vadd.f32 %v1279_v37, %v2455_v21  ;;  %v1227_v23 = vmul.f32 %v2139_v32, %v1195_v33  ;;  %v770_v40 = vld [vmem:[#allocation2 + $0xb8] sm:$0x3f] }
  0xad   : > { %v1282_v26 = vsel %vm1278_vm0, %v2463_v1, 0.0  ;;  %v1326_v54 = vmul.f32 %v2455_v21, %v2455_v21  ;;  %v1327_v58 = vmul.f32 %v2457_v56, %v2457_v56  ;;  %v568_v60 = vmul.f32 %v2020_v63, %v536_v27  ;;  %v684_v34 = vld [vmem:[#allocation2 + $0xba] sm:$0x3f] }
  0xae   : > { %v628_v20 = vmul.f32 %v1983_v41, %v596_v13  ;;  %v1281_v47 = vadd.f32 %v1280_v12, %v2461_v11  ;;  %v1329_v30 = vmul.f32 %v2463_v1, %v2463_v1  ;;  %v1169_v62 = vadd.f32 %v2910_v25, %v1081_v52  ;;  %v858_v39 = vld [vmem:[#allocation2 + $0xb9] sm:$0x3f]  ;;  %v686_v25 = vld [vmem:[#allocation2 + $0xca] sm:$0x3f] }
  0xaf   : > { %v1229_v0 = vmul.f32 %v2139_v32, %v1197_v19  ;;  %v2496_v29 = vadd.f32 %v1227_v23, %v1167_v24  ;;  %v1328_v44 = vmul.f32 %v2461_v11, %v2461_v11  ;;  %v1179_v10 = vadd.f32 %v1151_v51, %v1091_v43  ;;  %v946_v52 = vld [vmem:[#allocation2 + $0xba] sm:$0x3f]  ;;  %v538_v19 = vld [vmem:[#allocation2 + $0xc8] sm:$0x3f] }
  0xb0   : > { %v1239_v31 = vmul.f32 %v2139_v32, %v1207_v3  ;;  %v1283_v46 = vadd.f32 %v1282_v26, %v1281_v47  ;;  %v1354_v42 = vsel %vm1278_vm0, %v1327_v58, 0.0  ;;  %v2504_v55 = vmul.f32 %v2911_v22, %v2911_v22  ;;  %v598_v43 = vld [vmem:[#allocation2 + $0xc9] sm:$0x3f] }
  0xb1   : > { %v742_v33 = vadd.f32 %v714_v4, %v654_v14  ;;  %v802_v5 = vmul.f32 %v2055_v15, %v770_v40  ;;  %v1355_v27 = vadd.f32 %v1354_v42, %v1326_v54  ;;  %v2508_v13 = vadd.f32 %v2396_v9, %v1177_v59  ;;  %v1033_v54 = vld [vmem:[#allocation2 + $0xb8] sm:$0x3f] }
  0xb2   : > { %v716_v36 = vmul.f32 %v2032_v2, %v684_v34  ;;  %v1284_v32 = vadd.f32 %v1283_v46, %v2465_v35  ;;  %v1357_v24 = vsel %vm1278_vm0, %v1329_v30, 0.0  ;;  %v656_v37 = vadd.f32 %v628_v20, %v568_v60  ;;  %v1121_v40 = vld [vmem:[#allocation2 + $0xb9] sm:$0x3f] }
  0xb3   : > { %v2513_v51 = vadd.f32 %v1229_v0, %v1169_v62  ;;  %v1285_v14 = vsel %vm1278_vm0, %v2496_v29, 0.0  ;;  %v1356_v4 = vadd.f32 %v1355_v27, %v1328_v44  ;;  %v1004_v12 = vadd.f32 %v976_v17, %v916_v28  ;;  %v772_v28 = vld [vmem:[#allocation2 + $0xc8] sm:$0x3f]  ;;  %v600_v46 = vld [vmem:[#allocation2 + $0xd9] sm:$0x3f] }
  0xb4   : > { %v2517_v9 = vadd.f32 %v1239_v31, %v1179_v10  ;;  %v1286_v59 = vadd.f32 %v1285_v14, %v1284_v32  ;;  %v1331_v3 = vmul.f32 %v2496_v29, %v2496_v29  ;;  %v830_v23 = vadd.f32 %v802_v5, %v742_v33  ;;  %v540_v31 = vld [vmem:[#allocation2 + $0xd8] sm:$0x3f] }
  0xb5   : > { %v890_v26 = vmul.f32 %v1989_v45, %v858_v39  ;;  %v1330_v58 = vmul.f32 %v2465_v35, %v2465_v35  ;;  %v1358_v60 = vadd.f32 %v1357_v24, %v1356_v4  ;;  %v978_v20 = vmul.f32 %v2078_v38, %v946_v52  ;;  %v860_v24 = vld [vmem:[#allocation2 + $0xc9] sm:$0x3f]  ;;  %v774_v14 = vld [vmem:[#allocation2 + $0xd8] sm:$0x3f] }
  0xb6   : > { %v570_v47 = vmul.f32 %v2020_v63, %v538_v19  ;;  %v630_v17 = vmul.f32 %v1983_v41, %v598_v43  ;;  %v1287_v30 = vadd.f32 %v1286_v59, %v2469_v6  ;;  %v744_v34 = vadd.f32 %v716_v36, %v656_v37 }
  0xb7   : > { %v2530_v62 = vadd.f32 %v2348_v53, %v2345_v49  ;;  %v1288_v0 = vsel %vm1278_vm0, %v2513_v51, 0.0  ;;  %v1359_v44 = vadd.f32 %v1358_v60, %v1330_v58  ;;  %v1065_v10 = vmul.f32 %v2083_v48, %v1033_v54  ;;  %v688_v54 = vld [vmem:[#allocation2 + $0xda] sm:$0x3f] }
  0xb8   : > { %v1289_v42 = vadd.f32 %v1288_v0, %v1287_v30  ;;  %v1333_v33 = vmul.f32 %v2513_v51, %v2513_v51  ;;  %v1360_v5 = vsel %vm1278_vm0, %v1331_v3, 0.0  ;;  %v1153_v27 = vmul.f32 %v2040_v7, %v1121_v40  ;;  %v1035_v30 = vld [vmem:[#allocation2 + $0xc8] sm:$0x3f] }
  0xb9   : > { %v804_v36 = vmul.f32 %v2055_v15, %v772_v28  ;;  %v1332_v49 = vmul.f32 %v2469_v6, %v2469_v6  ;;  %v1361_v53 = vadd.f32 %v1360_v5, %v1359_v44  ;;  %v918_v39 = vadd.f32 %v890_v26, %v830_v23  ;;  %v1209_v44 = vld [vmem:[#allocation2 + $0xba] sm:$0x3f]  ;;  %v776_v5 = vld [vmem:[#allocation2 + $0xe8] sm:$0x3f] }
  0xba   : > { %v658_v52 = vadd.f32 %v630_v17, %v570_v47  ;;  %v718_v32 = vmul.f32 %v2032_v2, %v686_v25  ;;  %v1290_v37 = vadd.f32 %v1289_v42, %v2472_v16  ;;  %v572_v19 = vmul.f32 %v2020_v63, %v540_v31  ;;  %v948_v47 = vld [vmem:[#allocation2 + $0xca] sm:$0x3f]  ;;  %v2912_v25 = vld [vmem:[#allocation12_spill] sm:$0xff] }
  0xbb   : > { %v632_v43 = vmul.f32 %v1983_v41, %v600_v46  ;;  %v1291_v4 = vsel %vm1278_vm0, %v2530_v62, 0.0  ;;  %v1362_v59 = vadd.f32 %v1361_v53, %v1332_v49  ;;  %v1093_v3 = vadd.f32 %v1065_v10, %v1004_v12 }
  0xbc   : > { %v1292_v58 = vadd.f32 %v1291_v4, %v1290_v37  ;;  %v1335_v23 = vmul.f32 %v2530_v62, %v2530_v62  ;;  %v1363_v26 = vsel %vm1278_vm0, %v1333_v33, 0.0  ;;  %v832_v60 = vadd.f32 %v804_v36, %v744_v34  ;;  %v862_v34 = vld [vmem:[#allocation2 + $0xd9] sm:$0x3f] }
  0xbd   : > { %v892_v40 = vmul.f32 %v1989_v45, %v860_v24  ;;  %v1334_v41 = vmul.f32 %v2472_v16, %v2472_v16  ;;  %v1364_v63 = vadd.f32 %v1363_v26, %v1362_v59  ;;  %v1006_v17 = vadd.f32 %v978_v20, %v918_v39  ;;  %v2567_v24 = vld [vmem:[%s1967_s20 + $0x8] ss:$0 sm:$0xff] }
  0xbe   : > { %v746_v28 = vadd.f32 %v718_v32, %v658_v52  ;;  %v806_v12 = vmul.f32 %v2055_v15, %v774_v14  ;;  %v1293_v0 = vadd.f32 %v1292_v58, %v2912_v25  ;;  %v660_v10 = vadd.f32 %v632_v43, %v572_v19  ;;  %v1123_v52 = vld [vmem:[#allocation2 + $0xc9] sm:$0x3f]  ;;  %v2913_v14 = vld [vmem:[#allocation13_spill] sm:$0xff] }
  0xbf   : > { %v720_v31 = vmul.f32 %v2032_v2, %v688_v54  ;;  %v1294_v46 = vsel %vm1278_vm0, %v2374_v50, 0.0  ;;  %v1365_v42 = vadd.f32 %v1364_v63, %v1334_v41  ;;  %v980_v33 = vmul.f32 %v2078_v38, %v948_v47  ;;  %v950_v54 = vld [vmem:[#allocation2 + $0xda] sm:$0x3f]  ;;  %v864_v41 = vld [vmem:[#allocation2 + $0xe9] sm:$0x3f] }
  0xc0   : > { %v1295_v20 = vadd.f32 %v1294_v46, %v1293_v0  ;;  %v1337_v36 = vmul.f32 %v2374_v50, %v2374_v50  ;;  %v1366_v49 = vsel %vm1278_vm0, %v1335_v23, 0.0  ;;  %v920_v53 = vadd.f32 %v892_v40, %v832_v60  ;;  %v1037_v58 = vld [vmem:[#allocation2 + $0xd8] sm:$0x3f] }
  0xc1   : > { %v1067_v39 = vmul.f32 %v2083_v48, %v1035_v30  ;;  %v1336_v2 = vmul.f32 %v2912_v25, %v2912_v25  ;;  %v1367_v32 = vadd.f32 %v1366_v49, %v1365_v42  ;;  %v1241_v37 = vmul.f32 %v2567_v24, %v1209_v44  ;;  %v1125_v46 = vld [vmem:[#allocation2 + $0xd9] sm:$0x3f]  ;;  %v1039_v49 = vld [vmem:[#allocation2 + $0xe8] sm:$0x3f] }
  0xc2   : > { %v834_v19 = vadd.f32 %v806_v12, %v746_v28  ;;  %v894_v43 = vmul.f32 %v1989_v45, %v862_v34  ;;  %v1296_v4 = vadd.f32 %v1295_v20, %v2913_v14  ;;  %v748_v59 = vadd.f32 %v720_v31, %v660_v10  ;;  %v1211_v10 = vld [vmem:[#allocation2 + $0xca] sm:$0x3f] }
  0xc3   : > { %v808_v23 = vmul.f32 %v2055_v15, %v776_v5  ;;  %v1297_v26 = vsel %vm1278_vm0, %v2357_v61, 0.0  ;;  %v1368_v60 = vadd.f32 %v1367_v32, %v1336_v2  ;;  %v1181_v40 = vadd.f32 %v1153_v27, %v1093_v3 }
  0xc4   : > { %v1155_v47 = vmul.f32 %v2040_v7, %v1123_v52  ;;  %v1298_v63 = vadd.f32 %v1297_v26, %v1296_v4  ;;  %v1369_v28 = vsel %vm1278_vm0, %v1337_v36, 0.0  ;;  %v1008_v30 = vadd.f32 %v980_v33, %v920_v53  ;;  %v952_v36 = vld [vmem:[#allocation2 + $0xea] sm:$0x3f] }
  0xc5   : > { %v1095_v12 = vadd.f32 %v1067_v39, %v1006_v17  ;;  %v1338_v0 = vmul.f32 %v2913_v14, %v2913_v14  ;;  %v1370_v44 = vadd.f32 %v1369_v28, %v1368_v60  ;;  %v922_v31 = vadd.f32 %v894_v43, %v834_v19 }
  0xc6   : > { %v982_v15 = vmul.f32 %v2078_v38, %v950_v54  ;;  %v1069_v34 = vmul.f32 %v2083_v48, %v1037_v58  ;;  %v1299_v27 = vadd.f32 %v1298_v63, %v2911_v22  ;;  %v1300_v3 = vsel %vm1278_vm0, %v2508_v13, 0.0  ;;  %v2914_v54 = vld [vmem:[#allocation15_spill] sm:$0xff] }
  0xc7   : > { %v836_v42 = vadd.f32 %v808_v23, %v748_v59  ;;  %v896_v33 = vmul.f32 %v1989_v45, %v864_v41  ;;  %v1371_v17 = vadd.f32 %v1370_v44, %v1338_v0  ;;  %v1341_v5 = vmul.f32 %v2508_v13, %v2508_v13  ;;  %v1041_v45 = vld [vmem:[#allocation2 + $0xf8] sm:$0x3f] }
  0xc8   : > { %v1303_v20 = vsel %vm1278_vm0, %v2517_v9, 0.0  ;;  %v1301_v53 = vadd.f32 %v1300_v3, %v1299_v27  ;;  %v1372_v39 = vsel %vm1278_vm0, %v2378_v57, 0.0  ;;  %v2591_v52 = vadd.f32 %v1241_v37, %v1181_v40  ;;  %v1213_v23 = vld [vmem:[#allocation2 + $0xda] sm:$0x3f] }
  0xc9   : > { %v1183_v2 = vadd.f32 %v1155_v47, %v1095_v12  ;;  %v1243_v32 = vmul.f32 %v2567_v24, %v1211_v10  ;;  %v1373_v19 = vadd.f32 %v1372_v39, %v1371_v17  ;;  %v1010_v43 = vadd.f32 %v982_v15, %v922_v31  ;;  %v1127_v47 = vld [vmem:[#allocation2 + $0xe9] sm:$0x3f]  ;;  %v2915_v10 = vld [vmem:[#allocation18_spill] sm:$0xff]  ;;  %v1129_v15 = vld [vmem:[#allocation2 + $0xf9] sm:$0x3f] }
  0xca   : > { %v1097_v4 = vadd.f32 %v1069_v34, %v1008_v30  ;;  %v1157_v59 = vmul.f32 %v2040_v7, %v1125_v46  ;;  %v1302_v58 = vadd.f32 %v1301_v53, %v2914_v54  ;;  %v924_v26 = vadd.f32 %v896_v33, %v836_v42  ;;  %v1215_v33 = vld [vmem:[#allocation2 + $0xea] sm:$0x3f]  ;;  %v2916_v39 = vld [vmem:[#allocation22_spill] sm:$0xff] }
  0xcb   : > { %v984_v60 = vmul.f32 %v2078_v38, %v952_v36  ;;  %v1071_v41 = vmul.f32 %v2083_v48, %v1039_v49  ;;  %v1374_v57 = vadd.f32 %v1373_v19, %v2504_v55  ;;  %v1375_v37 = vsel %vm1278_vm0, %v1341_v5, 0.0 }
  0xcc   : > { %v1343_v40 = vmul.f32 %v2517_v9, %v2517_v9  ;;  %v1304_v63 = vadd.f32 %v1303_v20, %v1302_v58  ;;  %v1073_v28 = vmul.f32 %v2083_v48, %v1041_v45  ;;  %v1342_v30 = vmul.f32 %v2914_v54, %v2914_v54 }
  0xcd   : > { %v1306_v12 = vsel %vm1278_vm0, %v2591_v52, 0.0  ;;  %v1376_v38 = vadd.f32 %v1375_v37, %v1374_v57  ;;  %v2607_v0 = vadd.f32 %v1243_v32, %v1183_v2  ;;  %v1185_v44 = vadd.f32 %v1157_v59, %v1097_v4  ;;  %v1217_v32 = vld [vmem:[#allocation2 + $0xfa] sm:$0x3f] }
  0xce   : > { %v1245_v55 = vmul.f32 %v2567_v24, %v1213_v23  ;;  %v1305_v31 = vadd.f32 %v1304_v63, %v2915_v10  ;;  %v1012_v34 = vadd.f32 %v984_v60, %v924_v26  ;;  %v1099_v27 = vadd.f32 %v1071_v41, %v1010_v43  ;;  %v2917_v41 = vld [vmem:[#allocation25_spill] sm:$0xff] }
  0xcf   : > { %v1159_v3 = vmul.f32 %v2040_v7, %v1127_v47  ;;  %v1377_v48 = vadd.f32 %v1376_v38, %v1342_v30  ;;  %v1378_v46 = vsel %vm1278_vm0, %v1343_v40, 0.0  ;;  %v1345_v42 = vmul.f32 %v2591_v52, %v2591_v52 }
  0xd0   : > { %v1307_v17 = vadd.f32 %v1306_v12, %v1305_v31  ;;  %v1344_v5 = vmul.f32 %v2915_v10, %v2915_v10  ;;  %v1161_v36 = vmul.f32 %v2040_v7, %v1129_v15  ;;  %v1309_v49 = vsel %vm1278_vm0, %v2607_v0, 0.0 }
  0xd1   : > { %v1379_v20 = vadd.f32 %v1378_v46, %v1377_v48  ;;  %v2620_v53 = vadd.f32 %v1245_v55, %v1185_v44  ;;  %v1187_v19 = vadd.f32 %v1159_v3, %v1099_v27  ;;  %v1247_v45 = vmul.f32 %v2567_v24, %v1215_v33 }
  0xd2   : > { %v1308_v2 = vadd.f32 %v1307_v17, %v2916_v39  ;;  %v1101_v43 = vadd.f32 %v1073_v28, %v1012_v34  ;;  %v1381_v59 = vsel %vm1278_vm0, %v1345_v42, 0.0  ;;  %v1347_v58 = vmul.f32 %v2607_v0, %v2607_v0 }
  0xd3   : > { %v1380_v4 = vadd.f32 %v1379_v20, %v1344_v5  ;;  %v1346_v7 = vmul.f32 %v2916_v39, %v2916_v39  ;;  %v1249_v60 = vmul.f32 %v2567_v24, %v1217_v32  ;;  %v1312_v37 = vsel %vm1278_vm0, %v2620_v53, 0.0 }
  0xd4   : > { %v1310_v23 = vadd.f32 %v1309_v49, %v1308_v2  ;;  %v2633_v40 = vadd.f32 %v1247_v45, %v1187_v19  ;;  %v1189_v47 = vadd.f32 %v1161_v36, %v1101_v43  ;;  %v1384_v28 = vsel %vm1278_vm0, %v1347_v58, 0.0 }
  0xd5   : > { %v1382_v26 = vadd.f32 %v1381_v59, %v1380_v4  ;;  %v1349_v30 = vmul.f32 %v2620_v53, %v2620_v53  ;;  %v1348_v38 = vmul.f32 %v2917_v41, %v2917_v41  ;;  %v1350_v48 = vmul.f32 %v2353_v8, %v2353_v8 }
  0xd6   : > { %v1311_v57 = vadd.f32 %v1310_v23, %v2917_v41  ;;  %v1315_v55 = vsel %vm1278_vm0, %v2633_v40, 0.0  ;;  %v2643_v31 = vadd.f32 %v1249_v60, %v1189_v47  ;;  %v1351_v27 = vmul.f32 %v2633_v40, %v2633_v40 }
  0xd7   : > { %v1383_v63 = vadd.f32 %v1382_v26, %v1346_v7  ;;  %v1387_v34 = vsel %vm1278_vm0, %v1349_v30, 0.0  ;;  %v1352_v49 = vmul.f32 %v2381_v18, %v2381_v18 }
  0xd8   : > { %v1313_v12 = vadd.f32 %v1312_v37, %v1311_v57  ;;  %v1318_v33 = vsel %vm1278_vm0, %v2643_v31, 0.0  ;;  %v1390_v5 = vsel %vm1278_vm0, %v1351_v27, 0.0  ;;  %v1353_v20 = vmul.f32 %v2643_v31, %v2643_v31 }
  0xd9   : > { %v1385_v44 = vadd.f32 %v1384_v28, %v1383_v63 }
  0xda   : > { %v1314_v24 = vadd.f32 %v1313_v12, %v2353_v8  ;;  %v1393_v45 = vsel %vm1278_vm0, %v1353_v20, 0.0 }
  0xdb   : > { %v1386_v15 = vadd.f32 %v1385_v44, %v1348_v38 }
  0xdc   : > { %v1316_v3 = vadd.f32 %v1315_v55, %v1314_v24  ;;  %v1407_v24 = vld [vmem:[%s418_s26] sm:$0x1] }
  0xdd   : > { %v1388_v46 = vadd.f32 %v1387_v34, %v1386_v15  ;;  %v1409_v34 = vld [vmem:[%s421_s29] sm:$0x1] }
  0xde   : > { %v1317_v42 = vadd.f32 %v1316_v3, %v2381_v18  ;;  %v2918_v3 = vld [vmem:[#allocation6_spill] sm:$0xff] }
  0xdf   : > { %v1389_v17 = vadd.f32 %v1388_v46, %v1350_v48 }
  0xe0   : > { %v1319_v36 = vadd.f32 %v1318_v33, %v1317_v42 }
  0xe1   : > { %v1391_v2 = vadd.f32 %v1390_v5, %v1389_v17 }
  0xe2   : > { %v1320_v32 = vrot.slane %v1319_v36, 4 }
  0xe3   : > { %v1392_v19 = vadd.f32 %v1391_v2, %v1352_v49 }
  0xe4   : > { %v1321_v43 = vadd.f32 %v1320_v32, %v1319_v36 }
  0xe5   : > { %v1394_v4 = vadd.f32 %v1393_v45, %v1392_v19 }
  0xe6   : > { %v1322_v59 = vrot.slane %v1321_v43, 2 }
  0xe7   : > { %v1395_v58 = vrot.slane %v1394_v4, 4 }
  0xe8   : > { %v1323_v23 = vadd.f32 %v1322_v59, %v1321_v43 }
  0xe9   : > { %v1396_v7 = vadd.f32 %v1395_v58, %v1394_v4 }
  0xea   : > { %v1324_v26 = vrot.slane %v1323_v23, 1 }
  0xeb   : > { %v1397_v60 = vrot.slane %v1396_v7, 2 }
  0xec   : > { %v1325_v57 = vadd.f32 %v1324_v26, %v1323_v23 }
  0xed   : > { %v1398_v37 = vadd.f32 %v1397_v60, %v1396_v7 }
  0xee   : > { %v1401_v47 = vmul.f32 0.0051020407, %v1325_v57 }
  0xef   : > { %v1399_v63 = vrot.slane %v1398_v37, 1 }
  0xf0   : > { %v1403_v30 = vmul.f32 %v1401_v47, %v1401_v47 }
  0xf1   : > { %v1400_v28 = vadd.f32 %v1399_v63, %v1398_v37 }
  0xf3   : > { %v1402_v12 = vmul.f32 0.0051020407, %v1400_v28 }
  0xf5   : > { %v1404_v38 = vsub.f32 %v1402_v12, %v1403_v30 }
  0xf7   : > { %v1405_v44 = vadd.f32 0.001, %v1404_v38 }
  0xf9   : > { %1788 = vrsqrt.f32 %v1405_v44 }
 0x106   : > { %v1789_v55 = vpop.eup %1788 }
 0x107   : > { %v1408_v15 = vmul.f32 %v1789_v55, %v1407_v24 }
 0x109   : > { %v1410_v27 = vmul.f32 %v1408_v15, %v1401_v47  ;;  %v2668_v48 = vrot.slane %v1408_v15, %v2918_v3 }
 0x10b   : > { %v1411_v46 = vsub.f32 %v1409_v34, %v1410_v27  ;;  %v1416_v42 = vmul.f32 %v2668_v48, %v2455_v21  ;;  %v1417_v33 = vmul.f32 %v2668_v48, %v2457_v56  ;;  %v1418_v17 = vmul.f32 %v2668_v48, %v2461_v11 }
 0x10c   : > { %v1419_v5 = vmul.f32 %v2668_v48, %v2463_v1  ;;  %v1420_v20 = vmul.f32 %v2668_v48, %v2465_v35  ;;  %v1421_v36 = vmul.f32 %v2668_v48, %v2496_v29  ;;  %v1422_v49 = vmul.f32 %v2668_v48, %v2469_v6 }
 0x10d   : > { %v2685_v21 = vrot.slane %v1411_v46, %v2918_v3  ;;  %v1423_v56 = vmul.f32 %v2668_v48, %v2513_v51  ;;  %v1424_v11 = vmul.f32 %v2668_v48, %v2472_v16  ;;  %v1425_v1 = vmul.f32 %v2668_v48, %v2530_v62 }
 0x10e   : > { %v1426_v35 = vmul.f32 %v2668_v48, %v2912_v25  ;;  %v1427_v29 = vmul.f32 %v2668_v48, %v2374_v50  ;;  %v1428_v6 = vmul.f32 %v2668_v48, %v2913_v14  ;;  %v1429_v2 = vmul.f32 %v2668_v48, %v2357_v61 }
 0x10f   : > { %v1450_v51 = vadd.f32 %v2685_v21, %v1416_v42  ;;  %v1451_v32 = vadd.f32 %v2685_v21, %v1417_v33  ;;  %v1452_v16 = vadd.f32 %v2685_v21, %v1418_v17  ;;  %v1453_v62 = vadd.f32 %v2685_v21, %v1419_v5 }
 0x110   : > { %v1454_v19 = vadd.f32 %v2685_v21, %v1420_v20  ;;  %v1455_v25 = vadd.f32 %v2685_v21, %v1421_v36  ;;  %v1456_v50 = vadd.f32 %v2685_v21, %v1422_v49  ;;  %v1457_v45 = vadd.f32 %v2685_v21, %v1423_v56 }
 0x111   : > { %1478 = vst [vmem:[%s2710_s30] sm:$0xff] %v1450_v51  ;;  %1479 = vst [vmem:[%s2710_s30 + $0x8] sm:$0x3f] %v1451_v32  ;;  %v1458_v61 = vadd.f32 %v2685_v21, %v1424_v11  ;;  %v1459_v14 = vadd.f32 %v2685_v21, %v1425_v1  ;;  %v1460_v43 = vadd.f32 %v2685_v21, %v1426_v35 }
 0x112   : > { %1480 = vst [vmem:[%s2710_s30 + $0x10] sm:$0xff] %v1452_v16  ;;  %1481 = vst [vmem:[%s2710_s30 + $0x18] sm:$0x3f] %v1453_v62  ;;  %v1461_v4 = vadd.f32 %v2685_v21, %v1427_v29  ;;  %v1462_v59 = vadd.f32 %v2685_v21, %v1428_v6  ;;  %v1463_v58 = vadd.f32 %v2685_v21, %v1429_v2 }
 0x113   : > { %1482 = vst [vmem:[%s2710_s30 + $0x20] sm:$0xff] %v1454_v19  ;;  %1483 = vst [vmem:[%s2710_s30 + $0x28] sm:$0x3f] %v1455_v25  ;;  %v1430_v23 = vmul.f32 %v2668_v48, %v2911_v22  ;;  %v1431_v7 = vmul.f32 %v2668_v48, %v2508_v13  ;;  %v1432_v26 = vmul.f32 %v2668_v48, %v2914_v54 }
 0x114   : > { %1484 = vst [vmem:[%s2710_s30 + $0x30] sm:$0xff] %v1456_v50  ;;  %1485 = vst [vmem:[%s2710_s30 + $0x38] sm:$0x3f] %v1457_v45  ;;  %v1433_v60 = vmul.f32 %v2668_v48, %v2517_v9  ;;  %v1434_v57 = vmul.f32 %v2668_v48, %v2915_v10  ;;  %v1435_v22 = vmul.f32 %v2668_v48, %v2591_v52 }
 0x115   : > { %1486 = vst [vmem:[%s2710_s30 + $0x40] sm:$0xff] %v1458_v61  ;;  %1487 = vst [vmem:[%s2710_s30 + $0x48] sm:$0x3f] %v1459_v14  ;;  %v1464_v13 = vadd.f32 %v2685_v21, %v1430_v23  ;;  %v1465_v37 = vadd.f32 %v2685_v21, %v1431_v7  ;;  %v1436_v54 = vmul.f32 %v2668_v48, %v2916_v39 }
 0x116   : > { %1488 = vst [vmem:[%s2710_s30 + $0x50] sm:$0xff] %v1460_v43  ;;  %1489 = vst [vmem:[%s2710_s30 + $0x58] sm:$0x3f] %v1461_v4  ;;  %v1437_v9 = vmul.f32 %v2668_v48, %v2607_v0  ;;  %v1466_v10 = vadd.f32 %v2685_v21, %v1432_v26  ;;  %v1467_v52 = vadd.f32 %v2685_v21, %v1433_v60 }
 0x117   : > { %1490 = vst [vmem:[%s2710_s30 + $0x60] sm:$0xff] %v1462_v59  ;;  %1491 = vst [vmem:[%s2710_s30 + $0x68] sm:$0x3f] %v1463_v58  ;;  %v1468_v47 = vadd.f32 %v2685_v21, %v1434_v57  ;;  %v1469_v63 = vadd.f32 %v2685_v21, %v1435_v22  ;;  %v1470_v28 = vadd.f32 %v2685_v21, %v1436_v54 }
 0x118   : > { %1492 = vst [vmem:[%s2710_s30 + $0x70] sm:$0xff] %v1464_v13  ;;  %1493 = vst [vmem:[%s2710_s30 + $0x78] sm:$0x3f] %v1465_v37  ;;  %v1471_v30 = vadd.f32 %v2685_v21, %v1437_v9  ;;  %v1438_v39 = vmul.f32 %v2668_v48, %v2917_v41  ;;  %v1439_v0 = vmul.f32 %v2668_v48, %v2620_v53 }
 0x119   : > { %1494 = vst [vmem:[%s2710_s30 + $0x80] sm:$0xff] %v1466_v10  ;;  %1495 = vst [vmem:[%s2710_s30 + $0x88] sm:$0x3f] %v1467_v52  ;;  %v1440_v12 = vmul.f32 %v2668_v48, %v2353_v8  ;;  %v1441_v38 = vmul.f32 %v2668_v48, %v2633_v40  ;;  %v1442_v41 = vmul.f32 %v2668_v48, %v2381_v18  ;;  %v1597_v18 = vld [vmem:[%s2710_s30] sm:$0xff] (%p1877_p5)  ;;  %v1601_v34 = vld [vmem:[%s2710_s30 + $0x10] sm:$0xff] (%p1877_p5) }
 0x11a   : > { %1496 = vst [vmem:[%s2710_s30 + $0x90] sm:$0xff] %v1468_v47  ;;  %1497 = vst [vmem:[%s2710_s30 + $0x98] sm:$0x3f] %v1469_v63  ;;  %v1443_v53 = vmul.f32 %v2668_v48, %v2643_v31  ;;  %v1472_v44 = vadd.f32 %v2685_v21, %v1438_v39  ;;  %v1473_v24 = vadd.f32 %v2685_v21, %v1439_v0  ;;  %1512 = sbr.rel (!%p1877_p5) target bundleno = 301 (0x12d), region = 116  ;;  %v1599_v31 = vld [vmem:[%s2710_s30 + $0x8] sm:$0xff] (%p1877_p5)  ;;  %v1603_v27 = vld [vmem:[%s2710_s30 + $0x18] sm:$0xff] (%p1877_p5) }
 0x11b   : > { %1498 = vst [vmem:[%s2710_s30 + $0xa0] sm:$0xff] %v1470_v28  ;;  %1499 = vst [vmem:[%s2710_s30 + $0xa8] sm:$0x3f] %v1471_v30  ;;  %v1474_v55 = vadd.f32 %v2685_v21, %v1440_v12  ;;  %v1475_v8 = vadd.f32 %v2685_v21, %v1441_v38  ;;  %v1476_v15 = vadd.f32 %v2685_v21, %v1442_v41  ;;  %v1605_v3 = vld [vmem:[%s2710_s30 + $0x20] sm:$0xff] (%p1877_p5)  ;;  %v1607_v48 = vld [vmem:[%s2710_s30 + $0x28] sm:$0xff] (%p1877_p5) }
 0x11c   : > { %v1477_v40 = vadd.f32 %v2685_v21, %v1443_v53  ;;  %1500 = vst [vmem:[%s2710_s30 + $0xb0] sm:$0xff] %v1472_v44  ;;  %1501 = vst [vmem:[%s2710_s30 + $0xb8] sm:$0x3f] %v1473_v24  ;;  %v1609_v46 = vld [vmem:[%s2710_s30 + $0x30] sm:$0xff] (%p1877_p5)  ;;  %v1611_v42 = vld [vmem:[%s2710_s30 + $0x38] sm:$0xff] (%p1877_p5) }
 0x11d   : > { %1502 = vst [vmem:[%s2710_s30 + $0xc0] sm:$0xff] %v1474_v55  ;;  %1503 = vst [vmem:[%s2710_s30 + $0xc8] sm:$0x3f] %v1475_v8  ;;  %v1613_v33 = vld [vmem:[%s2710_s30 + $0x40] sm:$0xff] (%p1877_p5)  ;;  %v1615_v17 = vld [vmem:[%s2710_s30 + $0x48] sm:$0xff] (%p1877_p5) }
 0x11e   : > { %1504 = vst [vmem:[%s2710_s30 + $0xd0] sm:$0xff] %v1476_v15  ;;  %1505 = vst [vmem:[%s2710_s30 + $0xd8] sm:$0x3f] %v1477_v40  ;;  %v1617_v5 = vld [vmem:[%s2710_s30 + $0x50] sm:$0xff] (%p1877_p5)  ;;  %v1619_v20 = vld [vmem:[%s2710_s30 + $0x58] sm:$0xff] (%p1877_p5) }
 0x11f   : > { %1598 = vst [vmem:[%s2797_s8] sm:$0xff] %v1597_v18  ;;  %1600 = vst [vmem:[%s2797_s8 + $0x18] sm:$0xff] %v1599_v31  ;;  %v1621_v36 = vld [vmem:[%s2710_s30 + $0x60] sm:$0xff]  ;;  %v1623_v49 = vld [vmem:[%s2710_s30 + $0x68] sm:$0xff] }
 0x120   : > { %1602 = vst [vmem:[%s2797_s8 + $0x30] sm:$0xff] %v1601_v34  ;;  %1604 = vst [vmem:[%s2797_s8 + $0x48] sm:$0xff] %v1603_v27  ;;  %v1625_v21 = vld [vmem:[%s2710_s30 + $0x70] sm:$0xff]  ;;  %v1627_v56 = vld [vmem:[%s2710_s30 + $0x78] sm:$0xff] }
 0x121   : > { %1606 = vst [vmem:[%s2797_s8 + $0x60] sm:$0xff] %v1605_v3  ;;  %1608 = vst [vmem:[%s2797_s8 + $0x78] sm:$0xff] %v1607_v48  ;;  %v1629_v11 = vld [vmem:[%s2710_s30 + $0x80] sm:$0xff]  ;;  %v1631_v1 = vld [vmem:[%s2710_s30 + $0x88] sm:$0xff] }
 0x122   : > { %1610 = vst [vmem:[%s2797_s8 + $0x90] sm:$0xff] %v1609_v46  ;;  %1612 = vst [vmem:[%s2797_s8 + $0xa8] sm:$0xff] %v1611_v42  ;;  %v1633_v35 = vld [vmem:[%s2710_s30 + $0x90] sm:$0xff]  ;;  %v1635_v29 = vld [vmem:[%s2710_s30 + $0x98] sm:$0xff] }
 0x123   : > { %1614 = vst [vmem:[%s2797_s8 + $0xc0] sm:$0xff] %v1613_v33  ;;  %1616 = vst [vmem:[%s2797_s8 + $0xd8] sm:$0xff] %v1615_v17  ;;  %v1637_v6 = vld [vmem:[%s2710_s30 + $0xa0] sm:$0xff]  ;;  %v1639_v2 = vld [vmem:[%s2710_s30 + $0xa8] sm:$0xff] }
 0x124   : > { %1618 = vst [vmem:[%s2797_s8 + $0xf0] sm:$0xff] %v1617_v5  ;;  %1620 = vst [vmem:[%s2797_s8 + $0x108] sm:$0xff] %v1619_v20  ;;  %v1641_v51 = vld [vmem:[%s2710_s30 + $0xb0] sm:$0xff]  ;;  %v1643_v32 = vld [vmem:[%s2710_s30 + $0xb8] sm:$0xff] }
 0x125   : > { %1622 = vst [vmem:[%s2797_s8 + $0x120] sm:$0xff] %v1621_v36  ;;  %1624 = vst [vmem:[%s2797_s8 + $0x138] sm:$0xff] %v1623_v49  ;;  %v1645_v16 = vld [vmem:[%s2710_s30 + $0xc0] sm:$0xff]  ;;  %v1647_v62 = vld [vmem:[%s2710_s30 + $0xc8] sm:$0xff] }
 0x126   : > { %1626 = vst [vmem:[%s2797_s8 + $0x150] sm:$0xff] %v1625_v21  ;;  %1628 = vst [vmem:[%s2797_s8 + $0x168] sm:$0xff] %v1627_v56  ;;  %v1649_v19 = vld [vmem:[%s2710_s30 + $0xd0] sm:$0xff]  ;;  %v1651_v25 = vld [vmem:[%s2710_s30 + $0xd8] sm:$0xff] }
 0x127   : > { %1630 = vst [vmem:[%s2797_s8 + $0x180] sm:$0xff] %v1629_v11  ;;  %1632 = vst [vmem:[%s2797_s8 + $0x198] sm:$0xff] %v1631_v1 }
 0x128   : > { %1634 = vst [vmem:[%s2797_s8 + $0x1b0] sm:$0xff] %v1633_v35  ;;  %1636 = vst [vmem:[%s2797_s8 + $0x1c8] sm:$0xff] %v1635_v29 }
 0x129   : > { %1638 = vst [vmem:[%s2797_s8 + $0x1e0] sm:$0xff] %v1637_v6  ;;  %1640 = vst [vmem:[%s2797_s8 + $0x1f8] sm:$0xff] %v1639_v2 }
 0x12a   : > { %1642 = vst [vmem:[%s2797_s8 + $0x210] sm:$0xff] %v1641_v51  ;;  %1644 = vst [vmem:[%s2797_s8 + $0x228] sm:$0xff] %v1643_v32 }
 0x12b   : > { %1646 = vst [vmem:[%s2797_s8 + $0x240] sm:$0xff] %v1645_v16  ;;  %1648 = vst [vmem:[%s2797_s8 + $0x258] sm:$0xff] %v1647_v62 }
 0x12c   : > { %1650 = vst [vmem:[%s2797_s8 + $0x270] sm:$0xff] %v1649_v19  ;;  %1652 = vst [vmem:[%s2797_s8 + $0x288] sm:$0xff] %v1651_v25 }
 0x12d PF: > { %p11_p11 = scmp.ge.s32.totalorder %s1861_s19, 5   ;;  %s2919_s15 = smov %s1810_s16 }
 0x12e   : > { %s2920_s16 = smov %s1871_s22  ;;  %s2921_s17 = smov %s1861_s19 }
 0x12f   :  { %13 = sbr.rel (!%p11_p11) target bundleno = 2 (0x2), region = 201 }

</bundles_post_ra>
